<compile_context>
chip_gen: v6e
topology: v6e:2x2x1
jax: 0.10.0
libtpu: 0.0.40
codegen_flags: <defaults>
</compile_context>

<pallas_src>
import jax
import jax.numpy as jnp
from jax.experimental import pallas as pl
from jax.experimental.pallas import tpu as pltpu


def _make_fused_lstm_kernel(T, B, H, num_layers):
    """Builds the fused kernel: stacked LSTM over time + fc head, all in VMEM."""

    def kernel(*refs):
        # refs = [x, (w_ih^T, w_hh^T, bias) * L, w_fc^T, b_fc, out, gx_scratch, hseq_scratch]
        x_ref = refs[0]
        idx = 1
        layer_refs = []
        for _ in range(num_layers):
            layer_refs.append((refs[idx], refs[idx + 1], refs[idx + 2]))
            idx += 3
        wfc_ref, bfc_ref = refs[idx], refs[idx + 1]
        out_ref = refs[idx + 2]
        gx_ref = refs[idx + 3]      # (T, B, 4H) f32 VMEM: hoisted input-projection gates
        hseq_ref = refs[idx + 4]    # (T, B, H)  f32 VMEM: this layer's hidden sequence

        h_last = jnp.zeros((B, H), jnp.float32)
        for layer, (wih_ref, whh_ref, b_ref) in enumerate(layer_refs):
            # ---- hoisted input projection for ALL timesteps of this layer ----
            xin = x_ref[...] if layer == 0 else hseq_ref[...]       # (T, B, in_dim)
            in_dim = xin.shape[-1]
            gx = jnp.dot(xin.reshape(T * B, in_dim), wih_ref[...],
                         preferred_element_type=jnp.float32) + b_ref[...]
            gx_ref[...] = gx.reshape(T, B, 4 * H)

            whh = whh_ref[...]                                      # (H, 4H)

            # ---- sequential recurrence; h/c carried in registers ----
            def step(t, carry):
                h, c = carry
                gates = gx_ref[t] + jnp.dot(h, whh,
                                            preferred_element_type=jnp.float32)
                i = jax.nn.sigmoid(gates[:, 0 * H:1 * H])
                f = jax.nn.sigmoid(gates[:, 1 * H:2 * H])
                g = jnp.tanh(gates[:, 2 * H:3 * H])
                o = jax.nn.sigmoid(gates[:, 3 * H:4 * H])
                c_new = f * c + i * g
                h_new = o * jnp.tanh(c_new)
                hseq_ref[t] = h_new       # feeds the next layer (harmless for top layer)
                return (h_new, c_new)

            h0 = jnp.zeros((B, H), jnp.float32)
            c0 = jnp.zeros((B, H), jnp.float32)
            h_last, _ = jax.lax.fori_loop(0, T, step, (h0, c0), unroll=True)

        # ---- fused Linear(hidden, 1) head on out[:, -1, :] of the top layer ----
        out_ref[...] = (jnp.dot(h_last, wfc_ref[...],
                                preferred_element_type=jnp.float32)
                        + bfc_ref[...]).astype(out_ref.dtype)

    return kernel


def lstm_forward(x_btd, lstm_params, w_fc, b_fc):
    """Matches LSTM.forward: zero (h0, c0), stacked batch_first LSTM, fc(out[:, -1, :])."""
    x_btd = x_btd.astype(jnp.float32)
    B, T, I = x_btd.shape
    H = lstm_params[0][1].shape[1]          # w_hh: (4H, H)
    L = len(lstm_params)

    # Time-major keeps every per-step (B, *) slab contiguous in (sublane, lane);
    # this is a single ~few-KB XLA copy outside the kernel.
    x_tbi = jnp.transpose(x_btd, (1, 0, 2))

    inputs = [x_tbi]
    in_specs = [pl.BlockSpec((T, B, I), lambda i: (0, 0, 0))]
    for (w_ih, w_hh, b_ih, b_hh) in lstm_params:
        in_dim = w_ih.shape[1]
        inputs += [w_ih.T.astype(jnp.float32),
                   w_hh.T.astype(jnp.float32),
                   (b_ih + b_hh).reshape(1, 4 * H).astype(jnp.float32)]
        in_specs += [pl.BlockSpec((in_dim, 4 * H), lambda i: (0, 0)),
                     pl.BlockSpec((H, 4 * H), lambda i: (0, 0)),
                     pl.BlockSpec((1, 4 * H), lambda i: (0, 0))]
    inputs += [w_fc.T.astype(jnp.float32), b_fc.reshape(1, 1).astype(jnp.float32)]
    in_specs += [pl.BlockSpec((H, 1), lambda i: (0, 0)),
                 pl.BlockSpec((1, 1), lambda i: (0, 0))]

    kernel = _make_fused_lstm_kernel(T, B, H, L)
    return pl.pallas_call(
        kernel,
        out_shape=jax.ShapeDtypeStruct((B, 1), jnp.float32),
        grid_spec=pltpu.PrefetchScalarGridSpec(
            num_scalar_prefetch=0,
            grid=(1,),
            in_specs=in_specs,
            out_specs=pl.BlockSpec((B, 1), lambda i: (0, 0)),
            scratch_shapes=[
                pltpu.VMEM((T, B, 4 * H), jnp.float32),   # hoisted input-proj gates
                pltpu.VMEM((T, B, H), jnp.float32),       # per-layer hidden sequence
            ],
        ),
        compiler_params=pltpu.CompilerParams(
            dimension_semantics=("arbitrary",)),   # whole kernel is one sequential step
    )(*inputs)


def lstm_forward_ref(x_btd, lstm_params, w_fc, b_fc):
    """Pure-JAX reference (same math as torch.nn.LSTM + Linear) for correctness."""
    x = jnp.transpose(x_btd, (1, 0, 2)).astype(jnp.float32)   # (T, B, I)
    _, B, _ = x.shape
    H = lstm_params[0][1].shape[1]
    seq = x
    for (w_ih, w_hh, b_ih, b_hh) in lstm_params:
        def step(carry, x_t):
            h, c = carry
            gates = x_t @ w_ih.T + h @ w_hh.T + b_ih + b_hh
            i = jax.nn.sigmoid(gates[:, 0 * H:1 * H])
            f = jax.nn.sigmoid(gates[:, 1 * H:2 * H])
            g = jnp.tanh(gates[:, 2 * H:3 * H])
            o = jax.nn.sigmoid(gates[:, 3 * H:4 * H])
            c = f * c + i * g
            h = o * jnp.tanh(c)
            return (h, c), h
        init = (jnp.zeros((B, H), jnp.float32), jnp.zeros((B, H), jnp.float32))
        _, seq = jax.lax.scan(step, init, seq)
    return seq[-1] @ w_fc.T + b_fc


if __name__ == "__main__":
    B, T, I, H, L = 16, 8, 16, 32, 2   # batch, seq, input_size, hidden_size, layers

    key = jax.random.PRNGKey(0)
    keys = jax.random.split(key, 1 + 4 * L + 2)
    x = jax.random.normal(keys[0], (B, T, I), dtype=jnp.float32)

    bound = 1.0 / (H ** 0.5)  # PyTorch default init range for LSTM / Linear
    params = []
    ki = 1
    for l in range(L):
        in_dim = I if l == 0 else H
        w_ih = jax.random.uniform(keys[ki], (4 * H, in_dim), jnp.float32, -bound, bound); ki += 1
        w_hh = jax.random.uniform(keys[ki], (4 * H, H), jnp.float32, -bound, bound); ki += 1
        b_ih = jax.random.uniform(keys[ki], (4 * H,), jnp.float32, -bound, bound); ki += 1
        b_hh = jax.random.uniform(keys[ki], (4 * H,), jnp.float32, -bound, bound); ki += 1
        params.append((w_ih, w_hh, b_ih, b_hh))
    w_fc = jax.random.uniform(keys[ki], (1, H), jnp.float32, -bound, bound); ki += 1
    b_fc = jax.random.uniform(keys[ki], (1,), jnp.float32, -bound, bound)

    out = lstm_forward(x, params, w_fc, b_fc)
    jax.block_until_ready(out)
    assert out.shape == (B, 1) and out.dtype == jnp.float32

    ref = lstm_forward_ref(x, params, w_fc, b_fc)
    assert jnp.allclose(out, ref, rtol=1e-4, atol=1e-4), (
        f"max abs err {float(jnp.max(jnp.abs(out - ref)))}")
    print("KERNEL_OK")
</pallas_src>

<mosaic_0001>
module attributes {stable_mosaic.version = 11 : i64} {
  func.func @kernel(%arg0: i32, %arg1: memref<8x16x16xf32, #tpu.memory_space<vmem>>, %arg2: memref<16x128xf32, #tpu.memory_space<vmem>>, %arg3: memref<32x128xf32, #tpu.memory_space<vmem>>, %arg4: memref<1x128xf32, #tpu.memory_space<vmem>>, %arg5: memref<32x128xf32, #tpu.memory_space<vmem>>, %arg6: memref<32x128xf32, #tpu.memory_space<vmem>>, %arg7: memref<1x128xf32, #tpu.memory_space<vmem>>, %arg8: memref<32x1xf32, #tpu.memory_space<vmem>>, %arg9: memref<1x1xf32, #tpu.memory_space<vmem>>, %arg10: memref<16x1xf32, #tpu.memory_space<vmem>>, %arg11: memref<8x16x128xf32, #tpu.memory_space<vmem>>, %arg12: memref<8x16x32xf32, #tpu.memory_space<vmem>>) attributes {dimension_semantics = [#tpu.dimension_semantics<arbitrary>], iteration_bounds = array<i64: 1>, scalar_prefetch = 0 : i64, scratch_operands = 2 : i64, tpu.core_type = #tpu.core_type<tc>, window_params = [{pipeline_mode = #tpu.pipeline_mode<synchronous>, transform_indices = @transform_0, window_bounds = array<i64: 8, 16, 16>}, {pipeline_mode = #tpu.pipeline_mode<synchronous>, transform_indices = @transform_1, window_bounds = array<i64: 16, 128>}, {pipeline_mode = #tpu.pipeline_mode<synchronous>, transform_indices = @transform_2, window_bounds = array<i64: 32, 128>}, {pipeline_mode = #tpu.pipeline_mode<synchronous>, transform_indices = @transform_3, window_bounds = array<i64: 1, 128>}, {pipeline_mode = #tpu.pipeline_mode<synchronous>, transform_indices = @transform_4, window_bounds = array<i64: 32, 128>}, {pipeline_mode = #tpu.pipeline_mode<synchronous>, transform_indices = @transform_5, window_bounds = array<i64: 32, 128>}, {pipeline_mode = #tpu.pipeline_mode<synchronous>, transform_indices = @transform_6, window_bounds = array<i64: 1, 128>}, {pipeline_mode = #tpu.pipeline_mode<synchronous>, transform_indices = @transform_7, window_bounds = array<i64: 32, 1>}, {pipeline_mode = #tpu.pipeline_mode<synchronous>, transform_indices = @transform_8, window_bounds = array<i64: 1, 1>}, {pipeline_mode = #tpu.pipeline_mode<synchronous>, transform_indices = @transform_9, window_bounds = array<i64: 16, 1>}]} {
    %c0 = arith.constant 0 : index
    %c0_0 = arith.constant 0 : index
    %c0_1 = arith.constant 0 : index
    %0 = vector.load %arg1[%c0, %c0_0, %c0_1] : memref<8x16x16xf32, #tpu.memory_space<vmem>>, vector<8x16x16xf32>
    %1 = vector.shape_cast %0 : vector<8x16x16xf32> to vector<128x16xf32>
    %c0_2 = arith.constant 0 : index
    %c0_3 = arith.constant 0 : index
    %2 = vector.load %arg2[%c0_2, %c0_3] : memref<16x128xf32, #tpu.memory_space<vmem>>, vector<16x128xf32>
    %cst = arith.constant dense<0.000000e+00> : vector<128x128xf32>
    %3 = tpu.matmul %1, %2, %cst {dimension_numbers = #tpu.dot_dimension_numbers<[1], [0], [0], [1], [0, 0, 1, 1], [], []>} : vector<128x16xf32>, vector<16x128xf32>, vector<128x128xf32> -> vector<128x128xf32>
    %c0_4 = arith.constant 0 : index
    %c0_5 = arith.constant 0 : index
    %4 = vector.load %arg4[%c0_4, %c0_5] : memref<1x128xf32, #tpu.memory_space<vmem>>, vector<1x128xf32>
    %5 = vector.broadcast %4 : vector<1x128xf32> to vector<128x128xf32>
    %6 = arith.addf %3, %5 : vector<128x128xf32>
    %7 = vector.shape_cast %6 : vector<128x128xf32> to vector<8x16x128xf32>
    %c0_6 = arith.constant 0 : index
    %c0_7 = arith.constant 0 : index
    %c0_8 = arith.constant 0 : index
    %8 = vector.load %arg11[%c0_6, %c0_7, %c0_8] : memref<8x16x128xf32, #tpu.memory_space<vmem>>, vector<8x16x128xf32>
    tpu.vector_store %arg11[%c0_6, %c0_7, %c0_8], %7 {strides = array<i32>} : memref<8x16x128xf32, #tpu.memory_space<vmem>>, vector<8x16x128xf32>,
    %c0_9 = arith.constant 0 : index
    %c0_10 = arith.constant 0 : index
    %9 = vector.load %arg3[%c0_9, %c0_10] : memref<32x128xf32, #tpu.memory_space<vmem>>, vector<32x128xf32>
    %cst_11 = arith.constant 0.000000e+00 : f32
    %10 = vector.broadcast %cst_11 : f32 to vector<16x32xf32>
    %cst_12 = arith.constant 0.000000e+00 : f32
    %11 = vector.broadcast %cst_12 : f32 to vector<16x32xf32>
    %c0_i32 = arith.constant 0 : i32
    %12 = arith.index_cast %c0_i32 : i32 to index
    %c0_13 = arith.constant 0 : index
    %c0_14 = arith.constant 0 : index
    %13 = vector.load %arg11[%12, %c0_13, %c0_14] : memref<8x16x128xf32, #tpu.memory_space<vmem>>, vector<1x16x128xf32>
    %14 = vector.shape_cast %13 : vector<1x16x128xf32> to vector<16x128xf32>
    %cst_15 = arith.constant dense<0.000000e+00> : vector<16x128xf32>
    %15 = tpu.matmul %10, %9, %cst_15 {dimension_numbers = #tpu.dot_dimension_numbers<[1], [0], [0], [1], [0, 0, 1, 1], [], []>} : vector<16x32xf32>, vector<32x128xf32>, vector<16x128xf32> -> vector<16x128xf32>
    %16 = arith.addf %14, %15 : vector<16x128xf32>
    %17 = vector.extract_strided_slice %16 {offsets = [0, 0], sizes = [16, 32], strides = [1, 1]} : vector<16x128xf32> to vector<16x32xf32>
    %18 = arith.negf %17 : vector<16x32xf32>
    %19 = math.exp %18 : vector<16x32xf32>
    %cst_16 = arith.constant 1.000000e+00 : f32
    %20 = vector.broadcast %cst_16 : f32 to vector<16x32xf32>
    %21 = arith.addf %20, %19 : vector<16x32xf32>
    %22 = arith.divf %20, %21 : vector<16x32xf32>
    %23 = vector.extract_strided_slice %16 {offsets = [0, 32], sizes = [16, 32], strides = [1, 1]} : vector<16x128xf32> to vector<16x32xf32>
    %24 = arith.negf %23 : vector<16x32xf32>
    %25 = math.exp %24 : vector<16x32xf32>
    %cst_17 = arith.constant 1.000000e+00 : f32
    %26 = vector.broadcast %cst_17 : f32 to vector<16x32xf32>
    %27 = arith.addf %26, %25 : vector<16x32xf32>
    %28 = arith.divf %26, %27 : vector<16x32xf32>
    %29 = vector.extract_strided_slice %16 {offsets = [0, 64], sizes = [16, 32], strides = [1, 1]} : vector<16x128xf32> to vector<16x32xf32>
    %30 = math.tanh %29 : vector<16x32xf32>
    %31 = vector.extract_strided_slice %16 {offsets = [0, 96], sizes = [16, 32], strides = [1, 1]} : vector<16x128xf32> to vector<16x32xf32>
    %32 = arith.negf %31 : vector<16x32xf32>
    %33 = math.exp %32 : vector<16x32xf32>
    %cst_18 = arith.constant 1.000000e+00 : f32
    %34 = vector.broadcast %cst_18 : f32 to vector<16x32xf32>
    %35 = arith.addf %34, %33 : vector<16x32xf32>
    %36 = arith.divf %34, %35 : vector<16x32xf32>
    %37 = arith.mulf %28, %11 : vector<16x32xf32>
    %38 = arith.mulf %22, %30 : vector<16x32xf32>
    %39 = arith.addf %37, %38 : vector<16x32xf32>
    %40 = math.tanh %39 : vector<16x32xf32>
    %41 = arith.mulf %36, %40 : vector<16x32xf32>
    %42 = arith.index_cast %c0_i32 : i32 to index
    %c0_19 = arith.constant 0 : index
    %c0_20 = arith.constant 0 : index
    %43 = vector.load %arg12[%42, %c0_19, %c0_20] : memref<8x16x32xf32, #tpu.memory_space<vmem>>, vector<1x16x32xf32>
    %44 = vector.shape_cast %43 : vector<1x16x32xf32> to vector<16x32xf32>
    %45 = vector.shape_cast %41 : vector<16x32xf32> to vector<1x16x32xf32>
    tpu.vector_store %arg12[%42, %c0_19, %c0_20], %45 {strides = array<i32>} : memref<8x16x32xf32, #tpu.memory_space<vmem>>, vector<1x16x32xf32>,
    %c1_i32 = arith.constant 1 : i32
    %46 = arith.index_cast %c1_i32 : i32 to index
    %c0_21 = arith.constant 0 : index
    %c0_22 = arith.constant 0 : index
    %47 = vector.load %arg11[%46, %c0_21, %c0_22] : memref<8x16x128xf32, #tpu.memory_space<vmem>>, vector<1x16x128xf32>
    %48 = vector.shape_cast %47 : vector<1x16x128xf32> to vector<16x128xf32>
    %cst_23 = arith.constant dense<0.000000e+00> : vector<16x128xf32>
    %49 = tpu.matmul %41, %9, %cst_23 {dimension_numbers = #tpu.dot_dimension_numbers<[1], [0], [0], [1], [0, 0, 1, 1], [], []>} : vector<16x32xf32>, vector<32x128xf32>, vector<16x128xf32> -> vector<16x128xf32>
    %50 = arith.addf %48, %49 : vector<16x128xf32>
    %51 = vector.extract_strided_slice %50 {offsets = [0, 0], sizes = [16, 32], strides = [1, 1]} : vector<16x128xf32> to vector<16x32xf32>
    %52 = arith.negf %51 : vector<16x32xf32>
    %53 = math.exp %52 : vector<16x32xf32>
    %cst_24 = arith.constant 1.000000e+00 : f32
    %54 = vector.broadcast %cst_24 : f32 to vector<16x32xf32>
    %55 = arith.addf %54, %53 : vector<16x32xf32>
    %56 = arith.divf %54, %55 : vector<16x32xf32>
    %57 = vector.extract_strided_slice %50 {offsets = [0, 32], sizes = [16, 32], strides = [1, 1]} : vector<16x128xf32> to vector<16x32xf32>
    %58 = arith.negf %57 : vector<16x32xf32>
    %59 = math.exp %58 : vector<16x32xf32>
    %cst_25 = arith.constant 1.000000e+00 : f32
    %60 = vector.broadcast %cst_25 : f32 to vector<16x32xf32>
    %61 = arith.addf %60, %59 : vector<16x32xf32>
    %62 = arith.divf %60, %61 : vector<16x32xf32>
    %63 = vector.extract_strided_slice %50 {offsets = [0, 64], sizes = [16, 32], strides = [1, 1]} : vector<16x128xf32> to vector<16x32xf32>
    %64 = math.tanh %63 : vector<16x32xf32>
    %65 = vector.extract_strided_slice %50 {offsets = [0, 96], sizes = [16, 32], strides = [1, 1]} : vector<16x128xf32> to vector<16x32xf32>
    %66 = arith.negf %65 : vector<16x32xf32>
    %67 = math.exp %66 : vector<16x32xf32>
    %cst_26 = arith.constant 1.000000e+00 : f32
    %68 = vector.broadcast %cst_26 : f32 to vector<16x32xf32>
    %69 = arith.addf %68, %67 : vector<16x32xf32>
    %70 = arith.divf %68, %69 : vector<16x32xf32>
    %71 = arith.mulf %62, %39 : vector<16x32xf32>
    %72 = arith.mulf %56, %64 : vector<16x32xf32>
    %73 = arith.addf %71, %72 : vector<16x32xf32>
    %74 = math.tanh %73 : vector<16x32xf32>
    %75 = arith.mulf %70, %74 : vector<16x32xf32>
    %76 = arith.index_cast %c1_i32 : i32 to index
    %c0_27 = arith.constant 0 : index
    %c0_28 = arith.constant 0 : index
    %77 = vector.load %arg12[%76, %c0_27, %c0_28] : memref<8x16x32xf32, #tpu.memory_space<vmem>>, vector<1x16x32xf32>
    %78 = vector.shape_cast %77 : vector<1x16x32xf32> to vector<16x32xf32>
    %79 = vector.shape_cast %75 : vector<16x32xf32> to vector<1x16x32xf32>
    tpu.vector_store %arg12[%76, %c0_27, %c0_28], %79 {strides = array<i32>} : memref<8x16x32xf32, #tpu.memory_space<vmem>>, vector<1x16x32xf32>,
    %c2_i32 = arith.constant 2 : i32
    %80 = arith.index_cast %c2_i32 : i32 to index
    %c0_29 = arith.constant 0 : index
    %c0_30 = arith.constant 0 : index
    %81 = vector.load %arg11[%80, %c0_29, %c0_30] : memref<8x16x128xf32, #tpu.memory_space<vmem>>, vector<1x16x128xf32>
    %82 = vector.shape_cast %81 : vector<1x16x128xf32> to vector<16x128xf32>
    %cst_31 = arith.constant dense<0.000000e+00> : vector<16x128xf32>
    %83 = tpu.matmul %75, %9, %cst_31 {dimension_numbers = #tpu.dot_dimension_numbers<[1], [0], [0], [1], [0, 0, 1, 1], [], []>} : vector<16x32xf32>, vector<32x128xf32>, vector<16x128xf32> -> vector<16x128xf32>
    %84 = arith.addf %82, %83 : vector<16x128xf32>
    %85 = vector.extract_strided_slice %84 {offsets = [0, 0], sizes = [16, 32], strides = [1, 1]} : vector<16x128xf32> to vector<16x32xf32>
    %86 = arith.negf %85 : vector<16x32xf32>
    %87 = math.exp %86 : vector<16x32xf32>
    %cst_32 = arith.constant 1.000000e+00 : f32
    %88 = vector.broadcast %cst_32 : f32 to vector<16x32xf32>
    %89 = arith.addf %88, %87 : vector<16x32xf32>
    %90 = arith.divf %88, %89 : vector<16x32xf32>
    %91 = vector.extract_strided_slice %84 {offsets = [0, 32], sizes = [16, 32], strides = [1, 1]} : vector<16x128xf32> to vector<16x32xf32>
    %92 = arith.negf %91 : vector<16x32xf32>
    %93 = math.exp %92 : vector<16x32xf32>
    %cst_33 = arith.constant 1.000000e+00 : f32
    %94 = vector.broadcast %cst_33 : f32 to vector<16x32xf32>
    %95 = arith.addf %94, %93 : vector<16x32xf32>
    %96 = arith.divf %94, %95 : vector<16x32xf32>
    %97 = vector.extract_strided_slice %84 {offsets = [0, 64], sizes = [16, 32], strides = [1, 1]} : vector<16x128xf32> to vector<16x32xf32>
    %98 = math.tanh %97 : vector<16x32xf32>
    %99 = vector.extract_strided_slice %84 {offsets = [0, 96], sizes = [16, 32], strides = [1, 1]} : vector<16x128xf32> to vector<16x32xf32>
    %100 = arith.negf %99 : vector<16x32xf32>
    %101 = math.exp %100 : vector<16x32xf32>
    %cst_34 = arith.constant 1.000000e+00 : f32
    %102 = vector.broadcast %cst_34 : f32 to vector<16x32xf32>
    %103 = arith.addf %102, %101 : vector<16x32xf32>
    %104 = arith.divf %102, %103 : vector<16x32xf32>
    %105 = arith.mulf %96, %73 : vector<16x32xf32>
    %106 = arith.mulf %90, %98 : vector<16x32xf32>
    %107 = arith.addf %105, %106 : vector<16x32xf32>
    %108 = math.tanh %107 : vector<16x32xf32>
    %109 = arith.mulf %104, %108 : vector<16x32xf32>
    %110 = arith.index_cast %c2_i32 : i32 to index
    %c0_35 = arith.constant 0 : index
    %c0_36 = arith.constant 0 : index
    %111 = vector.load %arg12[%110, %c0_35, %c0_36] : memref<8x16x32xf32, #tpu.memory_space<vmem>>, vector<1x16x32xf32>
    %112 = vector.shape_cast %111 : vector<1x16x32xf32> to vector<16x32xf32>
    %113 = vector.shape_cast %109 : vector<16x32xf32> to vector<1x16x32xf32>
    tpu.vector_store %arg12[%110, %c0_35, %c0_36], %113 {strides = array<i32>} : memref<8x16x32xf32, #tpu.memory_space<vmem>>, vector<1x16x32xf32>,
    %c3_i32 = arith.constant 3 : i32
    %114 = arith.index_cast %c3_i32 : i32 to index
    %c0_37 = arith.constant 0 : index
    %c0_38 = arith.constant 0 : index
    %115 = vector.load %arg11[%114, %c0_37, %c0_38] : memref<8x16x128xf32, #tpu.memory_space<vmem>>, vector<1x16x128xf32>
    %116 = vector.shape_cast %115 : vector<1x16x128xf32> to vector<16x128xf32>
    %cst_39 = arith.constant dense<0.000000e+00> : vector<16x128xf32>
    %117 = tpu.matmul %109, %9, %cst_39 {dimension_numbers = #tpu.dot_dimension_numbers<[1], [0], [0], [1], [0, 0, 1, 1], [], []>} : vector<16x32xf32>, vector<32x128xf32>, vector<16x128xf32> -> vector<16x128xf32>
    %118 = arith.addf %116, %117 : vector<16x128xf32>
    %119 = vector.extract_strided_slice %118 {offsets = [0, 0], sizes = [16, 32], strides = [1, 1]} : vector<16x128xf32> to vector<16x32xf32>
    %120 = arith.negf %119 : vector<16x32xf32>
    %121 = math.exp %120 : vector<16x32xf32>
    %cst_40 = arith.constant 1.000000e+00 : f32
    %122 = vector.broadcast %cst_40 : f32 to vector<16x32xf32>
    %123 = arith.addf %122, %121 : vector<16x32xf32>
    %124 = arith.divf %122, %123 : vector<16x32xf32>
    %125 = vector.extract_strided_slice %118 {offsets = [0, 32], sizes = [16, 32], strides = [1, 1]} : vector<16x128xf32> to vector<16x32xf32>
    %126 = arith.negf %125 : vector<16x32xf32>
    %127 = math.exp %126 : vector<16x32xf32>
    %cst_41 = arith.constant 1.000000e+00 : f32
    %128 = vector.broadcast %cst_41 : f32 to vector<16x32xf32>
    %129 = arith.addf %128, %127 : vector<16x32xf32>
    %130 = arith.divf %128, %129 : vector<16x32xf32>
    %131 = vector.extract_strided_slice %118 {offsets = [0, 64], sizes = [16, 32], strides = [1, 1]} : vector<16x128xf32> to vector<16x32xf32>
    %132 = math.tanh %131 : vector<16x32xf32>
    %133 = vector.extract_strided_slice %118 {offsets = [0, 96], sizes = [16, 32], strides = [1, 1]} : vector<16x128xf32> to vector<16x32xf32>
    %134 = arith.negf %133 : vector<16x32xf32>
    %135 = math.exp %134 : vector<16x32xf32>
    %cst_42 = arith.constant 1.000000e+00 : f32
    %136 = vector.broadcast %cst_42 : f32 to vector<16x32xf32>
    %137 = arith.addf %136, %135 : vector<16x32xf32>
    %138 = arith.divf %136, %137 : vector<16x32xf32>
    %139 = arith.mulf %130, %107 : vector<16x32xf32>
    %140 = arith.mulf %124, %132 : vector<16x32xf32>
    %141 = arith.addf %139, %140 : vector<16x32xf32>
    %142 = math.tanh %141 : vector<16x32xf32>
    %143 = arith.mulf %138, %142 : vector<16x32xf32>
    %144 = arith.index_cast %c3_i32 : i32 to index
    %c0_43 = arith.constant 0 : index
    %c0_44 = arith.constant 0 : index
    %145 = vector.load %arg12[%144, %c0_43, %c0_44] : memref<8x16x32xf32, #tpu.memory_space<vmem>>, vector<1x16x32xf32>
    %146 = vector.shape_cast %145 : vector<1x16x32xf32> to vector<16x32xf32>
    %147 = vector.shape_cast %143 : vector<16x32xf32> to vector<1x16x32xf32>
    tpu.vector_store %arg12[%144, %c0_43, %c0_44], %147 {strides = array<i32>} : memref<8x16x32xf32, #tpu.memory_space<vmem>>, vector<1x16x32xf32>,
    %c4_i32 = arith.constant 4 : i32
    %148 = arith.index_cast %c4_i32 : i32 to index
    %c0_45 = arith.constant 0 : index
    %c0_46 = arith.constant 0 : index
    %149 = vector.load %arg11[%148, %c0_45, %c0_46] : memref<8x16x128xf32, #tpu.memory_space<vmem>>, vector<1x16x128xf32>
    %150 = vector.shape_cast %149 : vector<1x16x128xf32> to vector<16x128xf32>
    %cst_47 = arith.constant dense<0.000000e+00> : vector<16x128xf32>
    %151 = tpu.matmul %143, %9, %cst_47 {dimension_numbers = #tpu.dot_dimension_numbers<[1], [0], [0], [1], [0, 0, 1, 1], [], []>} : vector<16x32xf32>, vector<32x128xf32>, vector<16x128xf32> -> vector<16x128xf32>
    %152 = arith.addf %150, %151 : vector<16x128xf32>
    %153 = vector.extract_strided_slice %152 {offsets = [0, 0], sizes = [16, 32], strides = [1, 1]} : vector<16x128xf32> to vector<16x32xf32>
    %154 = arith.negf %153 : vector<16x32xf32>
    %155 = math.exp %154 : vector<16x32xf32>
    %cst_48 = arith.constant 1.000000e+00 : f32
    %156 = vector.broadcast %cst_48 : f32 to vector<16x32xf32>
    %157 = arith.addf %156, %155 : vector<16x32xf32>
    %158 = arith.divf %156, %157 : vector<16x32xf32>
    %159 = vector.extract_strided_slice %152 {offsets = [0, 32], sizes = [16, 32], strides = [1, 1]} : vector<16x128xf32> to vector<16x32xf32>
    %160 = arith.negf %159 : vector<16x32xf32>
    %161 = math.exp %160 : vector<16x32xf32>
    %cst_49 = arith.constant 1.000000e+00 : f32
    %162 = vector.broadcast %cst_49 : f32 to vector<16x32xf32>
    %163 = arith.addf %162, %161 : vector<16x32xf32>
    %164 = arith.divf %162, %163 : vector<16x32xf32>
    %165 = vector.extract_strided_slice %152 {offsets = [0, 64], sizes = [16, 32], strides = [1, 1]} : vector<16x128xf32> to vector<16x32xf32>
    %166 = math.tanh %165 : vector<16x32xf32>
    %167 = vector.extract_strided_slice %152 {offsets = [0, 96], sizes = [16, 32], strides = [1, 1]} : vector<16x128xf32> to vector<16x32xf32>
    %168 = arith.negf %167 : vector<16x32xf32>
    %169 = math.exp %168 : vector<16x32xf32>
    %cst_50 = arith.constant 1.000000e+00 : f32
    %170 = vector.broadcast %cst_50 : f32 to vector<16x32xf32>
    %171 = arith.addf %170, %169 : vector<16x32xf32>
    %172 = arith.divf %170, %171 : vector<16x32xf32>
    %173 = arith.mulf %164, %141 : vector<16x32xf32>
    %174 = arith.mulf %158, %166 : vector<16x32xf32>
    %175 = arith.addf %173, %174 : vector<16x32xf32>
    %176 = math.tanh %175 : vector<16x32xf32>
    %177 = arith.mulf %172, %176 : vector<16x32xf32>
    %178 = arith.index_cast %c4_i32 : i32 to index
    %c0_51 = arith.constant 0 : index
    %c0_52 = arith.constant 0 : index
    %179 = vector.load %arg12[%178, %c0_51, %c0_52] : memref<8x16x32xf32, #tpu.memory_space<vmem>>, vector<1x16x32xf32>
    %180 = vector.shape_cast %179 : vector<1x16x32xf32> to vector<16x32xf32>
    %181 = vector.shape_cast %177 : vector<16x32xf32> to vector<1x16x32xf32>
    tpu.vector_store %arg12[%178, %c0_51, %c0_52], %181 {strides = array<i32>} : memref<8x16x32xf32, #tpu.memory_space<vmem>>, vector<1x16x32xf32>,
    %c5_i32 = arith.constant 5 : i32
    %182 = arith.index_cast %c5_i32 : i32 to index
    %c0_53 = arith.constant 0 : index
    %c0_54 = arith.constant 0 : index
    %183 = vector.load %arg11[%182, %c0_53, %c0_54] : memref<8x16x128xf32, #tpu.memory_space<vmem>>, vector<1x16x128xf32>
    %184 = vector.shape_cast %183 : vector<1x16x128xf32> to vector<16x128xf32>
    %cst_55 = arith.constant dense<0.000000e+00> : vector<16x128xf32>
    %185 = tpu.matmul %177, %9, %cst_55 {dimension_numbers = #tpu.dot_dimension_numbers<[1], [0], [0], [1], [0, 0, 1, 1], [], []>} : vector<16x32xf32>, vector<32x128xf32>, vector<16x128xf32> -> vector<16x128xf32>
    %186 = arith.addf %184, %185 : vector<16x128xf32>
    %187 = vector.extract_strided_slice %186 {offsets = [0, 0], sizes = [16, 32], strides = [1, 1]} : vector<16x128xf32> to vector<16x32xf32>
    %188 = arith.negf %187 : vector<16x32xf32>
    %189 = math.exp %188 : vector<16x32xf32>
    %cst_56 = arith.constant 1.000000e+00 : f32
    %190 = vector.broadcast %cst_56 : f32 to vector<16x32xf32>
    %191 = arith.addf %190, %189 : vector<16x32xf32>
    %192 = arith.divf %190, %191 : vector<16x32xf32>
    %193 = vector.extract_strided_slice %186 {offsets = [0, 32], sizes = [16, 32], strides = [1, 1]} : vector<16x128xf32> to vector<16x32xf32>
    %194 = arith.negf %193 : vector<16x32xf32>
    %195 = math.exp %194 : vector<16x32xf32>
    %cst_57 = arith.constant 1.000000e+00 : f32
    %196 = vector.broadcast %cst_57 : f32 to vector<16x32xf32>
    %197 = arith.addf %196, %195 : vector<16x32xf32>
    %198 = arith.divf %196, %197 : vector<16x32xf32>
    %199 = vector.extract_strided_slice %186 {offsets = [0, 64], sizes = [16, 32], strides = [1, 1]} : vector<16x128xf32> to vector<16x32xf32>
    %200 = math.tanh %199 : vector<16x32xf32>
    %201 = vector.extract_strided_slice %186 {offsets = [0, 96], sizes = [16, 32], strides = [1, 1]} : vector<16x128xf32> to vector<16x32xf32>
    %202 = arith.negf %201 : vector<16x32xf32>
    %203 = math.exp %202 : vector<16x32xf32>
    %cst_58 = arith.constant 1.000000e+00 : f32
    %204 = vector.broadcast %cst_58 : f32 to vector<16x32xf32>
    %205 = arith.addf %204, %203 : vector<16x32xf32>
    %206 = arith.divf %204, %205 : vector<16x32xf32>
    %207 = arith.mulf %198, %175 : vector<16x32xf32>
    %208 = arith.mulf %192, %200 : vector<16x32xf32>
    %209 = arith.addf %207, %208 : vector<16x32xf32>
    %210 = math.tanh %209 : vector<16x32xf32>
    %211 = arith.mulf %206, %210 : vector<16x32xf32>
    %212 = arith.index_cast %c5_i32 : i32 to index
    %c0_59 = arith.constant 0 : index
    %c0_60 = arith.constant 0 : index
    %213 = vector.load %arg12[%212, %c0_59, %c0_60] : memref<8x16x32xf32, #tpu.memory_space<vmem>>, vector<1x16x32xf32>
    %214 = vector.shape_cast %213 : vector<1x16x32xf32> to vector<16x32xf32>
    %215 = vector.shape_cast %211 : vector<16x32xf32> to vector<1x16x32xf32>
    tpu.vector_store %arg12[%212, %c0_59, %c0_60], %215 {strides = array<i32>} : memref<8x16x32xf32, #tpu.memory_space<vmem>>, vector<1x16x32xf32>,
    %c6_i32 = arith.constant 6 : i32
    %216 = arith.index_cast %c6_i32 : i32 to index
    %c0_61 = arith.constant 0 : index
    %c0_62 = arith.constant 0 : index
    %217 = vector.load %arg11[%216, %c0_61, %c0_62] : memref<8x16x128xf32, #tpu.memory_space<vmem>>, vector<1x16x128xf32>
    %218 = vector.shape_cast %217 : vector<1x16x128xf32> to vector<16x128xf32>
    %cst_63 = arith.constant dense<0.000000e+00> : vector<16x128xf32>
    %219 = tpu.matmul %211, %9, %cst_63 {dimension_numbers = #tpu.dot_dimension_numbers<[1], [0], [0], [1], [0, 0, 1, 1], [], []>} : vector<16x32xf32>, vector<32x128xf32>, vector<16x128xf32> -> vector<16x128xf32>
    %220 = arith.addf %218, %219 : vector<16x128xf32>
    %221 = vector.extract_strided_slice %220 {offsets = [0, 0], sizes = [16, 32], strides = [1, 1]} : vector<16x128xf32> to vector<16x32xf32>
    %222 = arith.negf %221 : vector<16x32xf32>
    %223 = math.exp %222 : vector<16x32xf32>
    %cst_64 = arith.constant 1.000000e+00 : f32
    %224 = vector.broadcast %cst_64 : f32 to vector<16x32xf32>
    %225 = arith.addf %224, %223 : vector<16x32xf32>
    %226 = arith.divf %224, %225 : vector<16x32xf32>
    %227 = vector.extract_strided_slice %220 {offsets = [0, 32], sizes = [16, 32], strides = [1, 1]} : vector<16x128xf32> to vector<16x32xf32>
    %228 = arith.negf %227 : vector<16x32xf32>
    %229 = math.exp %228 : vector<16x32xf32>
    %cst_65 = arith.constant 1.000000e+00 : f32
    %230 = vector.broadcast %cst_65 : f32 to vector<16x32xf32>
    %231 = arith.addf %230, %229 : vector<16x32xf32>
    %232 = arith.divf %230, %231 : vector<16x32xf32>
    %233 = vector.extract_strided_slice %220 {offsets = [0, 64], sizes = [16, 32], strides = [1, 1]} : vector<16x128xf32> to vector<16x32xf32>
    %234 = math.tanh %233 : vector<16x32xf32>
    %235 = vector.extract_strided_slice %220 {offsets = [0, 96], sizes = [16, 32], strides = [1, 1]} : vector<16x128xf32> to vector<16x32xf32>
    %236 = arith.negf %235 : vector<16x32xf32>
    %237 = math.exp %236 : vector<16x32xf32>
    %cst_66 = arith.constant 1.000000e+00 : f32
    %238 = vector.broadcast %cst_66 : f32 to vector<16x32xf32>
    %239 = arith.addf %238, %237 : vector<16x32xf32>
    %240 = arith.divf %238, %239 : vector<16x32xf32>
    %241 = arith.mulf %232, %209 : vector<16x32xf32>
    %242 = arith.mulf %226, %234 : vector<16x32xf32>
    %243 = arith.addf %241, %242 : vector<16x32xf32>
    %244 = math.tanh %243 : vector<16x32xf32>
    %245 = arith.mulf %240, %244 : vector<16x32xf32>
    %246 = arith.index_cast %c6_i32 : i32 to index
    %c0_67 = arith.constant 0 : index
    %c0_68 = arith.constant 0 : index
    %247 = vector.load %arg12[%246, %c0_67, %c0_68] : memref<8x16x32xf32, #tpu.memory_space<vmem>>, vector<1x16x32xf32>
    %248 = vector.shape_cast %247 : vector<1x16x32xf32> to vector<16x32xf32>
    %249 = vector.shape_cast %245 : vector<16x32xf32> to vector<1x16x32xf32>
    tpu.vector_store %arg12[%246, %c0_67, %c0_68], %249 {strides = array<i32>} : memref<8x16x32xf32, #tpu.memory_space<vmem>>, vector<1x16x32xf32>,
    %c7_i32 = arith.constant 7 : i32
    %250 = arith.index_cast %c7_i32 : i32 to index
    %c0_69 = arith.constant 0 : index
    %c0_70 = arith.constant 0 : index
    %251 = vector.load %arg11[%250, %c0_69, %c0_70] : memref<8x16x128xf32, #tpu.memory_space<vmem>>, vector<1x16x128xf32>
    %252 = vector.shape_cast %251 : vector<1x16x128xf32> to vector<16x128xf32>
    %cst_71 = arith.constant dense<0.000000e+00> : vector<16x128xf32>
    %253 = tpu.matmul %245, %9, %cst_71 {dimension_numbers = #tpu.dot_dimension_numbers<[1], [0], [0], [1], [0, 0, 1, 1], [], []>} : vector<16x32xf32>, vector<32x128xf32>, vector<16x128xf32> -> vector<16x128xf32>
    %254 = arith.addf %252, %253 : vector<16x128xf32>
    %255 = vector.extract_strided_slice %254 {offsets = [0, 0], sizes = [16, 32], strides = [1, 1]} : vector<16x128xf32> to vector<16x32xf32>
    %256 = arith.negf %255 : vector<16x32xf32>
    %257 = math.exp %256 : vector<16x32xf32>
    %cst_72 = arith.constant 1.000000e+00 : f32
    %258 = vector.broadcast %cst_72 : f32 to vector<16x32xf32>
    %259 = arith.addf %258, %257 : vector<16x32xf32>
    %260 = arith.divf %258, %259 : vector<16x32xf32>
    %261 = vector.extract_strided_slice %254 {offsets = [0, 32], sizes = [16, 32], strides = [1, 1]} : vector<16x128xf32> to vector<16x32xf32>
    %262 = arith.negf %261 : vector<16x32xf32>
    %263 = math.exp %262 : vector<16x32xf32>
    %cst_73 = arith.constant 1.000000e+00 : f32
    %264 = vector.broadcast %cst_73 : f32 to vector<16x32xf32>
    %265 = arith.addf %264, %263 : vector<16x32xf32>
    %266 = arith.divf %264, %265 : vector<16x32xf32>
    %267 = vector.extract_strided_slice %254 {offsets = [0, 64], sizes = [16, 32], strides = [1, 1]} : vector<16x128xf32> to vector<16x32xf32>
    %268 = math.tanh %267 : vector<16x32xf32>
    %269 = vector.extract_strided_slice %254 {offsets = [0, 96], sizes = [16, 32], strides = [1, 1]} : vector<16x128xf32> to vector<16x32xf32>
    %270 = arith.negf %269 : vector<16x32xf32>
    %271 = math.exp %270 : vector<16x32xf32>
    %cst_74 = arith.constant 1.000000e+00 : f32
    %272 = vector.broadcast %cst_74 : f32 to vector<16x32xf32>
    %273 = arith.addf %272, %271 : vector<16x32xf32>
    %274 = arith.divf %272, %273 : vector<16x32xf32>
    %275 = arith.mulf %266, %243 : vector<16x32xf32>
    %276 = arith.mulf %260, %268 : vector<16x32xf32>
    %277 = arith.addf %275, %276 : vector<16x32xf32>
    %278 = math.tanh %277 : vector<16x32xf32>
    %279 = arith.mulf %274, %278 : vector<16x32xf32>
    %280 = arith.index_cast %c7_i32 : i32 to index
    %c0_75 = arith.constant 0 : index
    %c0_76 = arith.constant 0 : index
    %281 = vector.load %arg12[%280, %c0_75, %c0_76] : memref<8x16x32xf32, #tpu.memory_space<vmem>>, vector<1x16x32xf32>
    %282 = vector.shape_cast %281 : vector<1x16x32xf32> to vector<16x32xf32>
    %283 = vector.shape_cast %279 : vector<16x32xf32> to vector<1x16x32xf32>
    tpu.vector_store %arg12[%280, %c0_75, %c0_76], %283 {strides = array<i32>} : memref<8x16x32xf32, #tpu.memory_space<vmem>>, vector<1x16x32xf32>,
    %c8_i32 = arith.constant 8 : i32
    %c0_77 = arith.constant 0 : index
    %c0_78 = arith.constant 0 : index
    %c0_79 = arith.constant 0 : index
    %284 = vector.load %arg12[%c0_77, %c0_78, %c0_79] : memref<8x16x32xf32, #tpu.memory_space<vmem>>, vector<8x16x32xf32>
    %285 = vector.shape_cast %284 : vector<8x16x32xf32> to vector<128x32xf32>
    %c0_80 = arith.constant 0 : index
    %c0_81 = arith.constant 0 : index
    %286 = vector.load %arg5[%c0_80, %c0_81] : memref<32x128xf32, #tpu.memory_space<vmem>>, vector<32x128xf32>
    %cst_82 = arith.constant dense<0.000000e+00> : vector<128x128xf32>
    %287 = tpu.matmul %285, %286, %cst_82 {dimension_numbers = #tpu.dot_dimension_numbers<[1], [0], [0], [1], [0, 0, 1, 1], [], []>} : vector<128x32xf32>, vector<32x128xf32>, vector<128x128xf32> -> vector<128x128xf32>
    %c0_83 = arith.constant 0 : index
    %c0_84 = arith.constant 0 : index
    %288 = vector.load %arg7[%c0_83, %c0_84] : memref<1x128xf32, #tpu.memory_space<vmem>>, vector<1x128xf32>
    %289 = vector.broadcast %288 : vector<1x128xf32> to vector<128x128xf32>
    %290 = arith.addf %287, %289 : vector<128x128xf32>
    %291 = vector.shape_cast %290 : vector<128x128xf32> to vector<8x16x128xf32>
    %c0_85 = arith.constant 0 : index
    %c0_86 = arith.constant 0 : index
    %c0_87 = arith.constant 0 : index
    %292 = vector.load %arg11[%c0_85, %c0_86, %c0_87] : memref<8x16x128xf32, #tpu.memory_space<vmem>>, vector<8x16x128xf32>
    tpu.vector_store %arg11[%c0_85, %c0_86, %c0_87], %291 {strides = array<i32>} : memref<8x16x128xf32, #tpu.memory_space<vmem>>, vector<8x16x128xf32>,
    %c0_88 = arith.constant 0 : index
    %c0_89 = arith.constant 0 : index
    %293 = vector.load %arg6[%c0_88, %c0_89] : memref<32x128xf32, #tpu.memory_space<vmem>>, vector<32x128xf32>
    %cst_90 = arith.constant 0.000000e+00 : f32
    %294 = vector.broadcast %cst_90 : f32 to vector<16x32xf32>
    %cst_91 = arith.constant 0.000000e+00 : f32
    %295 = vector.broadcast %cst_91 : f32 to vector<16x32xf32>
    %c0_i32_92 = arith.constant 0 : i32
    %296 = arith.index_cast %c0_i32_92 : i32 to index
    %c0_93 = arith.constant 0 : index
    %c0_94 = arith.constant 0 : index
    %297 = vector.load %arg11[%296, %c0_93, %c0_94] : memref<8x16x128xf32, #tpu.memory_space<vmem>>, vector<1x16x128xf32>
    %298 = vector.shape_cast %297 : vector<1x16x128xf32> to vector<16x128xf32>
    %cst_95 = arith.constant dense<0.000000e+00> : vector<16x128xf32>
    %299 = tpu.matmul %294, %293, %cst_95 {dimension_numbers = #tpu.dot_dimension_numbers<[1], [0], [0], [1], [0, 0, 1, 1], [], []>} : vector<16x32xf32>, vector<32x128xf32>, vector<16x128xf32> -> vector<16x128xf32>
    %300 = arith.addf %298, %299 : vector<16x128xf32>
    %301 = vector.extract_strided_slice %300 {offsets = [0, 0], sizes = [16, 32], strides = [1, 1]} : vector<16x128xf32> to vector<16x32xf32>
    %302 = arith.negf %301 : vector<16x32xf32>
    %303 = math.exp %302 : vector<16x32xf32>
    %cst_96 = arith.constant 1.000000e+00 : f32
    %304 = vector.broadcast %cst_96 : f32 to vector<16x32xf32>
    %305 = arith.addf %304, %303 : vector<16x32xf32>
    %306 = arith.divf %304, %305 : vector<16x32xf32>
    %307 = vector.extract_strided_slice %300 {offsets = [0, 32], sizes = [16, 32], strides = [1, 1]} : vector<16x128xf32> to vector<16x32xf32>
    %308 = arith.negf %307 : vector<16x32xf32>
    %309 = math.exp %308 : vector<16x32xf32>
    %cst_97 = arith.constant 1.000000e+00 : f32
    %310 = vector.broadcast %cst_97 : f32 to vector<16x32xf32>
    %311 = arith.addf %310, %309 : vector<16x32xf32>
    %312 = arith.divf %310, %311 : vector<16x32xf32>
    %313 = vector.extract_strided_slice %300 {offsets = [0, 64], sizes = [16, 32], strides = [1, 1]} : vector<16x128xf32> to vector<16x32xf32>
    %314 = math.tanh %313 : vector<16x32xf32>
    %315 = vector.extract_strided_slice %300 {offsets = [0, 96], sizes = [16, 32], strides = [1, 1]} : vector<16x128xf32> to vector<16x32xf32>
    %316 = arith.negf %315 : vector<16x32xf32>
    %317 = math.exp %316 : vector<16x32xf32>
    %cst_98 = arith.constant 1.000000e+00 : f32
    %318 = vector.broadcast %cst_98 : f32 to vector<16x32xf32>
    %319 = arith.addf %318, %317 : vector<16x32xf32>
    %320 = arith.divf %318, %319 : vector<16x32xf32>
    %321 = arith.mulf %312, %295 : vector<16x32xf32>
    %322 = arith.mulf %306, %314 : vector<16x32xf32>
    %323 = arith.addf %321, %322 : vector<16x32xf32>
    %324 = math.tanh %323 : vector<16x32xf32>
    %325 = arith.mulf %320, %324 : vector<16x32xf32>
    %326 = arith.index_cast %c0_i32_92 : i32 to index
    %c0_99 = arith.constant 0 : index
    %c0_100 = arith.constant 0 : index
    %327 = vector.load %arg12[%326, %c0_99, %c0_100] : memref<8x16x32xf32, #tpu.memory_space<vmem>>, vector<1x16x32xf32>
    %328 = vector.shape_cast %327 : vector<1x16x32xf32> to vector<16x32xf32>
    %329 = vector.shape_cast %325 : vector<16x32xf32> to vector<1x16x32xf32>
    tpu.vector_store %arg12[%326, %c0_99, %c0_100], %329 {strides = array<i32>} : memref<8x16x32xf32, #tpu.memory_space<vmem>>, vector<1x16x32xf32>,
    %c1_i32_101 = arith.constant 1 : i32
    %330 = arith.index_cast %c1_i32_101 : i32 to index
    %c0_102 = arith.constant 0 : index
    %c0_103 = arith.constant 0 : index
    %331 = vector.load %arg11[%330, %c0_102, %c0_103] : memref<8x16x128xf32, #tpu.memory_space<vmem>>, vector<1x16x128xf32>
    %332 = vector.shape_cast %331 : vector<1x16x128xf32> to vector<16x128xf32>
    %cst_104 = arith.constant dense<0.000000e+00> : vector<16x128xf32>
    %333 = tpu.matmul %325, %293, %cst_104 {dimension_numbers = #tpu.dot_dimension_numbers<[1], [0], [0], [1], [0, 0, 1, 1], [], []>} : vector<16x32xf32>, vector<32x128xf32>, vector<16x128xf32> -> vector<16x128xf32>
    %334 = arith.addf %332, %333 : vector<16x128xf32>
    %335 = vector.extract_strided_slice %334 {offsets = [0, 0], sizes = [16, 32], strides = [1, 1]} : vector<16x128xf32> to vector<16x32xf32>
    %336 = arith.negf %335 : vector<16x32xf32>
    %337 = math.exp %336 : vector<16x32xf32>
    %cst_105 = arith.constant 1.000000e+00 : f32
    %338 = vector.broadcast %cst_105 : f32 to vector<16x32xf32>
    %339 = arith.addf %338, %337 : vector<16x32xf32>
    %340 = arith.divf %338, %339 : vector<16x32xf32>
    %341 = vector.extract_strided_slice %334 {offsets = [0, 32], sizes = [16, 32], strides = [1, 1]} : vector<16x128xf32> to vector<16x32xf32>
    %342 = arith.negf %341 : vector<16x32xf32>
    %343 = math.exp %342 : vector<16x32xf32>
    %cst_106 = arith.constant 1.000000e+00 : f32
    %344 = vector.broadcast %cst_106 : f32 to vector<16x32xf32>
    %345 = arith.addf %344, %343 : vector<16x32xf32>
    %346 = arith.divf %344, %345 : vector<16x32xf32>
    %347 = vector.extract_strided_slice %334 {offsets = [0, 64], sizes = [16, 32], strides = [1, 1]} : vector<16x128xf32> to vector<16x32xf32>
    %348 = math.tanh %347 : vector<16x32xf32>
    %349 = vector.extract_strided_slice %334 {offsets = [0, 96], sizes = [16, 32], strides = [1, 1]} : vector<16x128xf32> to vector<16x32xf32>
    %350 = arith.negf %349 : vector<16x32xf32>
    %351 = math.exp %350 : vector<16x32xf32>
    %cst_107 = arith.constant 1.000000e+00 : f32
    %352 = vector.broadcast %cst_107 : f32 to vector<16x32xf32>
    %353 = arith.addf %352, %351 : vector<16x32xf32>
    %354 = arith.divf %352, %353 : vector<16x32xf32>
    %355 = arith.mulf %346, %323 : vector<16x32xf32>
    %356 = arith.mulf %340, %348 : vector<16x32xf32>
    %357 = arith.addf %355, %356 : vector<16x32xf32>
    %358 = math.tanh %357 : vector<16x32xf32>
    %359 = arith.mulf %354, %358 : vector<16x32xf32>
    %360 = arith.index_cast %c1_i32_101 : i32 to index
    %c0_108 = arith.constant 0 : index
    %c0_109 = arith.constant 0 : index
    %361 = vector.load %arg12[%360, %c0_108, %c0_109] : memref<8x16x32xf32, #tpu.memory_space<vmem>>, vector<1x16x32xf32>
    %362 = vector.shape_cast %361 : vector<1x16x32xf32> to vector<16x32xf32>
    %363 = vector.shape_cast %359 : vector<16x32xf32> to vector<1x16x32xf32>
    tpu.vector_store %arg12[%360, %c0_108, %c0_109], %363 {strides = array<i32>} : memref<8x16x32xf32, #tpu.memory_space<vmem>>, vector<1x16x32xf32>,
    %c2_i32_110 = arith.constant 2 : i32
    %364 = arith.index_cast %c2_i32_110 : i32 to index
    %c0_111 = arith.constant 0 : index
    %c0_112 = arith.constant 0 : index
    %365 = vector.load %arg11[%364, %c0_111, %c0_112] : memref<8x16x128xf32, #tpu.memory_space<vmem>>, vector<1x16x128xf32>
    %366 = vector.shape_cast %365 : vector<1x16x128xf32> to vector<16x128xf32>
    %cst_113 = arith.constant dense<0.000000e+00> : vector<16x128xf32>
    %367 = tpu.matmul %359, %293, %cst_113 {dimension_numbers = #tpu.dot_dimension_numbers<[1], [0], [0], [1], [0, 0, 1, 1], [], []>} : vector<16x32xf32>, vector<32x128xf32>, vector<16x128xf32> -> vector<16x128xf32>
    %368 = arith.addf %366, %367 : vector<16x128xf32>
    %369 = vector.extract_strided_slice %368 {offsets = [0, 0], sizes = [16, 32], strides = [1, 1]} : vector<16x128xf32> to vector<16x32xf32>
    %370 = arith.negf %369 : vector<16x32xf32>
    %371 = math.exp %370 : vector<16x32xf32>
    %cst_114 = arith.constant 1.000000e+00 : f32
    %372 = vector.broadcast %cst_114 : f32 to vector<16x32xf32>
    %373 = arith.addf %372, %371 : vector<16x32xf32>
    %374 = arith.divf %372, %373 : vector<16x32xf32>
    %375 = vector.extract_strided_slice %368 {offsets = [0, 32], sizes = [16, 32], strides = [1, 1]} : vector<16x128xf32> to vector<16x32xf32>
    %376 = arith.negf %375 : vector<16x32xf32>
    %377 = math.exp %376 : vector<16x32xf32>
    %cst_115 = arith.constant 1.000000e+00 : f32
    %378 = vector.broadcast %cst_115 : f32 to vector<16x32xf32>
    %379 = arith.addf %378, %377 : vector<16x32xf32>
    %380 = arith.divf %378, %379 : vector<16x32xf32>
    %381 = vector.extract_strided_slice %368 {offsets = [0, 64], sizes = [16, 32], strides = [1, 1]} : vector<16x128xf32> to vector<16x32xf32>
    %382 = math.tanh %381 : vector<16x32xf32>
    %383 = vector.extract_strided_slice %368 {offsets = [0, 96], sizes = [16, 32], strides = [1, 1]} : vector<16x128xf32> to vector<16x32xf32>
    %384 = arith.negf %383 : vector<16x32xf32>
    %385 = math.exp %384 : vector<16x32xf32>
    %cst_116 = arith.constant 1.000000e+00 : f32
    %386 = vector.broadcast %cst_116 : f32 to vector<16x32xf32>
    %387 = arith.addf %386, %385 : vector<16x32xf32>
    %388 = arith.divf %386, %387 : vector<16x32xf32>
    %389 = arith.mulf %380, %357 : vector<16x32xf32>
    %390 = arith.mulf %374, %382 : vector<16x32xf32>
    %391 = arith.addf %389, %390 : vector<16x32xf32>
    %392 = math.tanh %391 : vector<16x32xf32>
    %393 = arith.mulf %388, %392 : vector<16x32xf32>
    %394 = arith.index_cast %c2_i32_110 : i32 to index
    %c0_117 = arith.constant 0 : index
    %c0_118 = arith.constant 0 : index
    %395 = vector.load %arg12[%394, %c0_117, %c0_118] : memref<8x16x32xf32, #tpu.memory_space<vmem>>, vector<1x16x32xf32>
    %396 = vector.shape_cast %395 : vector<1x16x32xf32> to vector<16x32xf32>
    %397 = vector.shape_cast %393 : vector<16x32xf32> to vector<1x16x32xf32>
    tpu.vector_store %arg12[%394, %c0_117, %c0_118], %397 {strides = array<i32>} : memref<8x16x32xf32, #tpu.memory_space<vmem>>, vector<1x16x32xf32>,
    %c3_i32_119 = arith.constant 3 : i32
    %398 = arith.index_cast %c3_i32_119 : i32 to index
    %c0_120 = arith.constant 0 : index
    %c0_121 = arith.constant 0 : index
    %399 = vector.load %arg11[%398, %c0_120, %c0_121] : memref<8x16x128xf32, #tpu.memory_space<vmem>>, vector<1x16x128xf32>
    %400 = vector.shape_cast %399 : vector<1x16x128xf32> to vector<16x128xf32>
    %cst_122 = arith.constant dense<0.000000e+00> : vector<16x128xf32>
    %401 = tpu.matmul %393, %293, %cst_122 {dimension_numbers = #tpu.dot_dimension_numbers<[1], [0], [0], [1], [0, 0, 1, 1], [], []>} : vector<16x32xf32>, vector<32x128xf32>, vector<16x128xf32> -> vector<16x128xf32>
    %402 = arith.addf %400, %401 : vector<16x128xf32>
    %403 = vector.extract_strided_slice %402 {offsets = [0, 0], sizes = [16, 32], strides = [1, 1]} : vector<16x128xf32> to vector<16x32xf32>
    %404 = arith.negf %403 : vector<16x32xf32>
    %405 = math.exp %404 : vector<16x32xf32>
    %cst_123 = arith.constant 1.000000e+00 : f32
    %406 = vector.broadcast %cst_123 : f32 to vector<16x32xf32>
    %407 = arith.addf %406, %405 : vector<16x32xf32>
    %408 = arith.divf %406, %407 : vector<16x32xf32>
    %409 = vector.extract_strided_slice %402 {offsets = [0, 32], sizes = [16, 32], strides = [1, 1]} : vector<16x128xf32> to vector<16x32xf32>
    %410 = arith.negf %409 : vector<16x32xf32>
    %411 = math.exp %410 : vector<16x32xf32>
    %cst_124 = arith.constant 1.000000e+00 : f32
    %412 = vector.broadcast %cst_124 : f32 to vector<16x32xf32>
    %413 = arith.addf %412, %411 : vector<16x32xf32>
    %414 = arith.divf %412, %413 : vector<16x32xf32>
    %415 = vector.extract_strided_slice %402 {offsets = [0, 64], sizes = [16, 32], strides = [1, 1]} : vector<16x128xf32> to vector<16x32xf32>
    %416 = math.tanh %415 : vector<16x32xf32>
    %417 = vector.extract_strided_slice %402 {offsets = [0, 96], sizes = [16, 32], strides = [1, 1]} : vector<16x128xf32> to vector<16x32xf32>
    %418 = arith.negf %417 : vector<16x32xf32>
    %419 = math.exp %418 : vector<16x32xf32>
    %cst_125 = arith.constant 1.000000e+00 : f32
    %420 = vector.broadcast %cst_125 : f32 to vector<16x32xf32>
    %421 = arith.addf %420, %419 : vector<16x32xf32>
    %422 = arith.divf %420, %421 : vector<16x32xf32>
    %423 = arith.mulf %414, %391 : vector<16x32xf32>
    %424 = arith.mulf %408, %416 : vector<16x32xf32>
    %425 = arith.addf %423, %424 : vector<16x32xf32>
    %426 = math.tanh %425 : vector<16x32xf32>
    %427 = arith.mulf %422, %426 : vector<16x32xf32>
    %428 = arith.index_cast %c3_i32_119 : i32 to index
    %c0_126 = arith.constant 0 : index
    %c0_127 = arith.constant 0 : index
    %429 = vector.load %arg12[%428, %c0_126, %c0_127] : memref<8x16x32xf32, #tpu.memory_space<vmem>>, vector<1x16x32xf32>
    %430 = vector.shape_cast %429 : vector<1x16x32xf32> to vector<16x32xf32>
    %431 = vector.shape_cast %427 : vector<16x32xf32> to vector<1x16x32xf32>
    tpu.vector_store %arg12[%428, %c0_126, %c0_127], %431 {strides = array<i32>} : memref<8x16x32xf32, #tpu.memory_space<vmem>>, vector<1x16x32xf32>,
    %c4_i32_128 = arith.constant 4 : i32
    %432 = arith.index_cast %c4_i32_128 : i32 to index
    %c0_129 = arith.constant 0 : index
    %c0_130 = arith.constant 0 : index
    %433 = vector.load %arg11[%432, %c0_129, %c0_130] : memref<8x16x128xf32, #tpu.memory_space<vmem>>, vector<1x16x128xf32>
    %434 = vector.shape_cast %433 : vector<1x16x128xf32> to vector<16x128xf32>
    %cst_131 = arith.constant dense<0.000000e+00> : vector<16x128xf32>
    %435 = tpu.matmul %427, %293, %cst_131 {dimension_numbers = #tpu.dot_dimension_numbers<[1], [0], [0], [1], [0, 0, 1, 1], [], []>} : vector<16x32xf32>, vector<32x128xf32>, vector<16x128xf32> -> vector<16x128xf32>
    %436 = arith.addf %434, %435 : vector<16x128xf32>
    %437 = vector.extract_strided_slice %436 {offsets = [0, 0], sizes = [16, 32], strides = [1, 1]} : vector<16x128xf32> to vector<16x32xf32>
    %438 = arith.negf %437 : vector<16x32xf32>
    %439 = math.exp %438 : vector<16x32xf32>
    %cst_132 = arith.constant 1.000000e+00 : f32
    %440 = vector.broadcast %cst_132 : f32 to vector<16x32xf32>
    %441 = arith.addf %440, %439 : vector<16x32xf32>
    %442 = arith.divf %440, %441 : vector<16x32xf32>
    %443 = vector.extract_strided_slice %436 {offsets = [0, 32], sizes = [16, 32], strides = [1, 1]} : vector<16x128xf32> to vector<16x32xf32>
    %444 = arith.negf %443 : vector<16x32xf32>
    %445 = math.exp %444 : vector<16x32xf32>
    %cst_133 = arith.constant 1.000000e+00 : f32
    %446 = vector.broadcast %cst_133 : f32 to vector<16x32xf32>
    %447 = arith.addf %446, %445 : vector<16x32xf32>
    %448 = arith.divf %446, %447 : vector<16x32xf32>
    %449 = vector.extract_strided_slice %436 {offsets = [0, 64], sizes = [16, 32], strides = [1, 1]} : vector<16x128xf32> to vector<16x32xf32>
    %450 = math.tanh %449 : vector<16x32xf32>
    %451 = vector.extract_strided_slice %436 {offsets = [0, 96], sizes = [16, 32], strides = [1, 1]} : vector<16x128xf32> to vector<16x32xf32>
    %452 = arith.negf %451 : vector<16x32xf32>
    %453 = math.exp %452 : vector<16x32xf32>
    %cst_134 = arith.constant 1.000000e+00 : f32
    %454 = vector.broadcast %cst_134 : f32 to vector<16x32xf32>
    %455 = arith.addf %454, %453 : vector<16x32xf32>
    %456 = arith.divf %454, %455 : vector<16x32xf32>
    %457 = arith.mulf %448, %425 : vector<16x32xf32>
    %458 = arith.mulf %442, %450 : vector<16x32xf32>
    %459 = arith.addf %457, %458 : vector<16x32xf32>
    %460 = math.tanh %459 : vector<16x32xf32>
    %461 = arith.mulf %456, %460 : vector<16x32xf32>
    %462 = arith.index_cast %c4_i32_128 : i32 to index
    %c0_135 = arith.constant 0 : index
    %c0_136 = arith.constant 0 : index
    %463 = vector.load %arg12[%462, %c0_135, %c0_136] : memref<8x16x32xf32, #tpu.memory_space<vmem>>, vector<1x16x32xf32>
    %464 = vector.shape_cast %463 : vector<1x16x32xf32> to vector<16x32xf32>
    %465 = vector.shape_cast %461 : vector<16x32xf32> to vector<1x16x32xf32>
    tpu.vector_store %arg12[%462, %c0_135, %c0_136], %465 {strides = array<i32>} : memref<8x16x32xf32, #tpu.memory_space<vmem>>, vector<1x16x32xf32>,
    %c5_i32_137 = arith.constant 5 : i32
    %466 = arith.index_cast %c5_i32_137 : i32 to index
    %c0_138 = arith.constant 0 : index
    %c0_139 = arith.constant 0 : index
    %467 = vector.load %arg11[%466, %c0_138, %c0_139] : memref<8x16x128xf32, #tpu.memory_space<vmem>>, vector<1x16x128xf32>
    %468 = vector.shape_cast %467 : vector<1x16x128xf32> to vector<16x128xf32>
    %cst_140 = arith.constant dense<0.000000e+00> : vector<16x128xf32>
    %469 = tpu.matmul %461, %293, %cst_140 {dimension_numbers = #tpu.dot_dimension_numbers<[1], [0], [0], [1], [0, 0, 1, 1], [], []>} : vector<16x32xf32>, vector<32x128xf32>, vector<16x128xf32> -> vector<16x128xf32>
    %470 = arith.addf %468, %469 : vector<16x128xf32>
    %471 = vector.extract_strided_slice %470 {offsets = [0, 0], sizes = [16, 32], strides = [1, 1]} : vector<16x128xf32> to vector<16x32xf32>
    %472 = arith.negf %471 : vector<16x32xf32>
    %473 = math.exp %472 : vector<16x32xf32>
    %cst_141 = arith.constant 1.000000e+00 : f32
    %474 = vector.broadcast %cst_141 : f32 to vector<16x32xf32>
    %475 = arith.addf %474, %473 : vector<16x32xf32>
    %476 = arith.divf %474, %475 : vector<16x32xf32>
    %477 = vector.extract_strided_slice %470 {offsets = [0, 32], sizes = [16, 32], strides = [1, 1]} : vector<16x128xf32> to vector<16x32xf32>
    %478 = arith.negf %477 : vector<16x32xf32>
    %479 = math.exp %478 : vector<16x32xf32>
    %cst_142 = arith.constant 1.000000e+00 : f32
    %480 = vector.broadcast %cst_142 : f32 to vector<16x32xf32>
    %481 = arith.addf %480, %479 : vector<16x32xf32>
    %482 = arith.divf %480, %481 : vector<16x32xf32>
    %483 = vector.extract_strided_slice %470 {offsets = [0, 64], sizes = [16, 32], strides = [1, 1]} : vector<16x128xf32> to vector<16x32xf32>
    %484 = math.tanh %483 : vector<16x32xf32>
    %485 = vector.extract_strided_slice %470 {offsets = [0, 96], sizes = [16, 32], strides = [1, 1]} : vector<16x128xf32> to vector<16x32xf32>
    %486 = arith.negf %485 : vector<16x32xf32>
    %487 = math.exp %486 : vector<16x32xf32>
    %cst_143 = arith.constant 1.000000e+00 : f32
    %488 = vector.broadcast %cst_143 : f32 to vector<16x32xf32>
    %489 = arith.addf %488, %487 : vector<16x32xf32>
    %490 = arith.divf %488, %489 : vector<16x32xf32>
    %491 = arith.mulf %482, %459 : vector<16x32xf32>
    %492 = arith.mulf %476, %484 : vector<16x32xf32>
    %493 = arith.addf %491, %492 : vector<16x32xf32>
    %494 = math.tanh %493 : vector<16x32xf32>
    %495 = arith.mulf %490, %494 : vector<16x32xf32>
    %496 = arith.index_cast %c5_i32_137 : i32 to index
    %c0_144 = arith.constant 0 : index
    %c0_145 = arith.constant 0 : index
    %497 = vector.load %arg12[%496, %c0_144, %c0_145] : memref<8x16x32xf32, #tpu.memory_space<vmem>>, vector<1x16x32xf32>
    %498 = vector.shape_cast %497 : vector<1x16x32xf32> to vector<16x32xf32>
    %499 = vector.shape_cast %495 : vector<16x32xf32> to vector<1x16x32xf32>
    tpu.vector_store %arg12[%496, %c0_144, %c0_145], %499 {strides = array<i32>} : memref<8x16x32xf32, #tpu.memory_space<vmem>>, vector<1x16x32xf32>,
    %c6_i32_146 = arith.constant 6 : i32
    %500 = arith.index_cast %c6_i32_146 : i32 to index
    %c0_147 = arith.constant 0 : index
    %c0_148 = arith.constant 0 : index
    %501 = vector.load %arg11[%500, %c0_147, %c0_148] : memref<8x16x128xf32, #tpu.memory_space<vmem>>, vector<1x16x128xf32>
    %502 = vector.shape_cast %501 : vector<1x16x128xf32> to vector<16x128xf32>
    %cst_149 = arith.constant dense<0.000000e+00> : vector<16x128xf32>
    %503 = tpu.matmul %495, %293, %cst_149 {dimension_numbers = #tpu.dot_dimension_numbers<[1], [0], [0], [1], [0, 0, 1, 1], [], []>} : vector<16x32xf32>, vector<32x128xf32>, vector<16x128xf32> -> vector<16x128xf32>
    %504 = arith.addf %502, %503 : vector<16x128xf32>
    %505 = vector.extract_strided_slice %504 {offsets = [0, 0], sizes = [16, 32], strides = [1, 1]} : vector<16x128xf32> to vector<16x32xf32>
    %506 = arith.negf %505 : vector<16x32xf32>
    %507 = math.exp %506 : vector<16x32xf32>
    %cst_150 = arith.constant 1.000000e+00 : f32
    %508 = vector.broadcast %cst_150 : f32 to vector<16x32xf32>
    %509 = arith.addf %508, %507 : vector<16x32xf32>
    %510 = arith.divf %508, %509 : vector<16x32xf32>
    %511 = vector.extract_strided_slice %504 {offsets = [0, 32], sizes = [16, 32], strides = [1, 1]} : vector<16x128xf32> to vector<16x32xf32>
    %512 = arith.negf %511 : vector<16x32xf32>
    %513 = math.exp %512 : vector<16x32xf32>
    %cst_151 = arith.constant 1.000000e+00 : f32
    %514 = vector.broadcast %cst_151 : f32 to vector<16x32xf32>
    %515 = arith.addf %514, %513 : vector<16x32xf32>
    %516 = arith.divf %514, %515 : vector<16x32xf32>
    %517 = vector.extract_strided_slice %504 {offsets = [0, 64], sizes = [16, 32], strides = [1, 1]} : vector<16x128xf32> to vector<16x32xf32>
    %518 = math.tanh %517 : vector<16x32xf32>
    %519 = vector.extract_strided_slice %504 {offsets = [0, 96], sizes = [16, 32], strides = [1, 1]} : vector<16x128xf32> to vector<16x32xf32>
    %520 = arith.negf %519 : vector<16x32xf32>
    %521 = math.exp %520 : vector<16x32xf32>
    %cst_152 = arith.constant 1.000000e+00 : f32
    %522 = vector.broadcast %cst_152 : f32 to vector<16x32xf32>
    %523 = arith.addf %522, %521 : vector<16x32xf32>
    %524 = arith.divf %522, %523 : vector<16x32xf32>
    %525 = arith.mulf %516, %493 : vector<16x32xf32>
    %526 = arith.mulf %510, %518 : vector<16x32xf32>
    %527 = arith.addf %525, %526 : vector<16x32xf32>
    %528 = math.tanh %527 : vector<16x32xf32>
    %529 = arith.mulf %524, %528 : vector<16x32xf32>
    %530 = arith.index_cast %c6_i32_146 : i32 to index
    %c0_153 = arith.constant 0 : index
    %c0_154 = arith.constant 0 : index
    %531 = vector.load %arg12[%530, %c0_153, %c0_154] : memref<8x16x32xf32, #tpu.memory_space<vmem>>, vector<1x16x32xf32>
    %532 = vector.shape_cast %531 : vector<1x16x32xf32> to vector<16x32xf32>
    %533 = vector.shape_cast %529 : vector<16x32xf32> to vector<1x16x32xf32>
    tpu.vector_store %arg12[%530, %c0_153, %c0_154], %533 {strides = array<i32>} : memref<8x16x32xf32, #tpu.memory_space<vmem>>, vector<1x16x32xf32>,
    %c7_i32_155 = arith.constant 7 : i32
    %534 = arith.index_cast %c7_i32_155 : i32 to index
    %c0_156 = arith.constant 0 : index
    %c0_157 = arith.constant 0 : index
    %535 = vector.load %arg11[%534, %c0_156, %c0_157] : memref<8x16x128xf32, #tpu.memory_space<vmem>>, vector<1x16x128xf32>
    %536 = vector.shape_cast %535 : vector<1x16x128xf32> to vector<16x128xf32>
    %cst_158 = arith.constant dense<0.000000e+00> : vector<16x128xf32>
    %537 = tpu.matmul %529, %293, %cst_158 {dimension_numbers = #tpu.dot_dimension_numbers<[1], [0], [0], [1], [0, 0, 1, 1], [], []>} : vector<16x32xf32>, vector<32x128xf32>, vector<16x128xf32> -> vector<16x128xf32>
    %538 = arith.addf %536, %537 : vector<16x128xf32>
    %539 = vector.extract_strided_slice %538 {offsets = [0, 0], sizes = [16, 32], strides = [1, 1]} : vector<16x128xf32> to vector<16x32xf32>
    %540 = arith.negf %539 : vector<16x32xf32>
    %541 = math.exp %540 : vector<16x32xf32>
    %cst_159 = arith.constant 1.000000e+00 : f32
    %542 = vector.broadcast %cst_159 : f32 to vector<16x32xf32>
    %543 = arith.addf %542, %541 : vector<16x32xf32>
    %544 = arith.divf %542, %543 : vector<16x32xf32>
    %545 = vector.extract_strided_slice %538 {offsets = [0, 32], sizes = [16, 32], strides = [1, 1]} : vector<16x128xf32> to vector<16x32xf32>
    %546 = arith.negf %545 : vector<16x32xf32>
    %547 = math.exp %546 : vector<16x32xf32>
    %cst_160 = arith.constant 1.000000e+00 : f32
    %548 = vector.broadcast %cst_160 : f32 to vector<16x32xf32>
    %549 = arith.addf %548, %547 : vector<16x32xf32>
    %550 = arith.divf %548, %549 : vector<16x32xf32>
    %551 = vector.extract_strided_slice %538 {offsets = [0, 64], sizes = [16, 32], strides = [1, 1]} : vector<16x128xf32> to vector<16x32xf32>
    %552 = math.tanh %551 : vector<16x32xf32>
    %553 = vector.extract_strided_slice %538 {offsets = [0, 96], sizes = [16, 32], strides = [1, 1]} : vector<16x128xf32> to vector<16x32xf32>
    %554 = arith.negf %553 : vector<16x32xf32>
    %555 = math.exp %554 : vector<16x32xf32>
    %cst_161 = arith.constant 1.000000e+00 : f32
    %556 = vector.broadcast %cst_161 : f32 to vector<16x32xf32>
    %557 = arith.addf %556, %555 : vector<16x32xf32>
    %558 = arith.divf %556, %557 : vector<16x32xf32>
    %559 = arith.mulf %550, %527 : vector<16x32xf32>
    %560 = arith.mulf %544, %552 : vector<16x32xf32>
    %561 = arith.addf %559, %560 : vector<16x32xf32>
    %562 = math.tanh %561 : vector<16x32xf32>
    %563 = arith.mulf %558, %562 : vector<16x32xf32>
    %564 = arith.index_cast %c7_i32_155 : i32 to index
    %c0_162 = arith.constant 0 : index
    %c0_163 = arith.constant 0 : index
    %565 = vector.load %arg12[%564, %c0_162, %c0_163] : memref<8x16x32xf32, #tpu.memory_space<vmem>>, vector<1x16x32xf32>
    %566 = vector.shape_cast %565 : vector<1x16x32xf32> to vector<16x32xf32>
    %567 = vector.shape_cast %563 : vector<16x32xf32> to vector<1x16x32xf32>
    tpu.vector_store %arg12[%564, %c0_162, %c0_163], %567 {strides = array<i32>} : memref<8x16x32xf32, #tpu.memory_space<vmem>>, vector<1x16x32xf32>,
    %c8_i32_164 = arith.constant 8 : i32
    %c0_165 = arith.constant 0 : index
    %c0_166 = arith.constant 0 : index
    %568 = vector.load %arg8[%c0_165, %c0_166] : memref<32x1xf32, #tpu.memory_space<vmem>>, vector<32x1xf32>
    %cst_167 = arith.constant dense<0.000000e+00> : vector<16x1xf32>
    %569 = tpu.matmul %563, %568, %cst_167 {dimension_numbers = #tpu.dot_dimension_numbers<[1], [0], [0], [1], [0, 0, 1, 1], [], []>} : vector<16x32xf32>, vector<32x1xf32>, vector<16x1xf32> -> vector<16x1xf32>
    %c0_168 = arith.constant 0 : index
    %c0_169 = arith.constant 0 : index
    %570 = vector.load %arg9[%c0_168, %c0_169] : memref<1x1xf32, #tpu.memory_space<vmem>>, vector<1x1xf32>
    %571 = vector.broadcast %570 : vector<1x1xf32> to vector<16x1xf32>
    %572 = arith.addf %569, %571 : vector<16x1xf32>
    %c0_170 = arith.constant 0 : index
    %c0_171 = arith.constant 0 : index
    %573 = vector.load %arg10[%c0_170, %c0_171] : memref<16x1xf32, #tpu.memory_space<vmem>>, vector<16x1xf32>
    tpu.vector_store %arg10[%c0_170, %c0_171], %572 {strides = array<i32>} : memref<16x1xf32, #tpu.memory_space<vmem>>, vector<16x1xf32>,
    return
  }
  func.func @transform_0(%arg0: i32) -> (i32, i32, i32) {
    %c0_i32 = arith.constant 0 : i32
    %c0_i32_0 = arith.constant 0 : i32
    %c0_i32_1 = arith.constant 0 : i32
    %c0_i32_2 = arith.constant 0 : i32
    return %c0_i32, %c0_i32_0, %c0_i32_1 : i32, i32, i32
  }
  func.func @transform_1(%arg0: i32) -> (i32, i32) {
    %c0_i32 = arith.constant 0 : i32
    %c0_i32_0 = arith.constant 0 : i32
    %c0_i32_1 = arith.constant 0 : i32
    return %c0_i32, %c0_i32_0 : i32, i32
  }
  func.func @transform_2(%arg0: i32) -> (i32, i32) {
    %c0_i32 = arith.constant 0 : i32
    %c0_i32_0 = arith.constant 0 : i32
    %c0_i32_1 = arith.constant 0 : i32
    return %c0_i32, %c0_i32_0 : i32, i32
  }
  func.func @transform_3(%arg0: i32) -> (i32, i32) {
    %c0_i32 = arith.constant 0 : i32
    %c0_i32_0 = arith.constant 0 : i32
    %c0_i32_1 = arith.constant 0 : i32
    return %c0_i32, %c0_i32_0 : i32, i32
  }
  func.func @transform_4(%arg0: i32) -> (i32, i32) {
    %c0_i32 = arith.constant 0 : i32
    %c0_i32_0 = arith.constant 0 : i32
    %c0_i32_1 = arith.constant 0 : i32
    return %c0_i32, %c0_i32_0 : i32, i32
  }
  func.func @transform_5(%arg0: i32) -> (i32, i32) {
    %c0_i32 = arith.constant 0 : i32
    %c0_i32_0 = arith.constant 0 : i32
    %c0_i32_1 = arith.constant 0 : i32
    return %c0_i32, %c0_i32_0 : i32, i32
  }
  func.func @transform_6(%arg0: i32) -> (i32, i32) {
    %c0_i32 = arith.constant 0 : i32
    %c0_i32_0 = arith.constant 0 : i32
    %c0_i32_1 = arith.constant 0 : i32
    return %c0_i32, %c0_i32_0 : i32, i32
  }
  func.func @transform_7(%arg0: i32) -> (i32, i32) {
    %c0_i32 = arith.constant 0 : i32
    %c0_i32_0 = arith.constant 0 : i32
    %c0_i32_1 = arith.constant 0 : i32
    return %c0_i32, %c0_i32_0 : i32, i32
  }
  func.func @transform_8(%arg0: i32) -> (i32, i32) {
    %c0_i32 = arith.constant 0 : i32
    %c0_i32_0 = arith.constant 0 : i32
    %c0_i32_1 = arith.constant 0 : i32
    return %c0_i32, %c0_i32_0 : i32, i32
  }
  func.func @transform_9(%arg0: i32) -> (i32, i32) {
    %c0_i32 = arith.constant 0 : i32
    %c0_i32_0 = arith.constant 0 : i32
    %c0_i32_1 = arith.constant 0 : i32
    return %c0_i32, %c0_i32_0 : i32, i32
  }
}

</mosaic_0001>

<bundles_post_ra>
// kernel: tpu_custom_call.1
= control target key start
LH: loop header
LB: loop body
LE: loop exit
PB: predicated region body
PF: predicated region fallthrough
CT: control target
= control target key end

     0   :  { %s4410_s0 = inlined_call_operand.hbm [shape: f32[8,16,16], index: 0, kind: input, shape index: {}]   ;;  %s4411_s1 = inlined_call_operand.hbm [shape: f32[16,128], index: 1, kind: input, shape index: {}]   ;;  %s4412_s2 = inlined_call_operand.vmem [shape: f32[32,128], index: 2, kind: input, shape index: {}]   ;;  %s4413_s3 = inlined_call_operand.vmem [shape: f32[1,128], index: 3, kind: input, shape index: {}]   ;;  %s4414_s4 = inlined_call_operand.hbm [shape: f32[32,128], index: 4, kind: input, shape index: {}]   ;;  %s4415_s5 = inlined_call_operand.hbm [shape: f32[32,128], index: 5, kind: input, shape index: {}]   ;;  %s4416_s6 = inlined_call_operand.vmem [shape: f32[1,128], index: 6, kind: input, shape index: {}]   ;;  %s4417_s7 = inlined_call_operand.vmem [shape: f32[32,1], index: 7, kind: input, shape index: {}]   ;;  %s4418_s8 = inlined_call_operand.<no memory space> [shape: f32[1,1], index: 8, kind: input, shape index: {}]   ;;  %s4419_s9 = inlined_call_operand.vmem [shape: f32[16,1], index: 9, kind: output, shape index: {}]  }
   0x1   :  { %v14_v0 = vstv %s4418_s8 }
   0x2   :  { %15 = vst [vmem:[#allocation4] sm:$0x1] %v14_v0 }
   0x3   :  { %16 = vsyncpa [#allocation6], 0 }
   0x4   :  { %17 = vsyncpa [#allocation8], 0 }
   0x5   :  { %18 = vsyncpa [#allocation11], 0  ;;  %s3770_s11 = smov [#allocation7]   ;;  %s3771_s13 = smov [#allocation5]  }
   0x6   :  { %s36_s12 = sshll.u32 %s3770_s11, 4  ;;  %s24_s14 = sshll.u32 %s3771_s13, 4  ;;  %s37_s12 = int_to_ptr.vmem [resolvable:$true] %s36_s12  ;;  %s25_s14 = int_to_ptr.vmem [resolvable:$true] %s24_s14 }
   0x7   :  { %s3692_s15 = scalar_lea.vmem %s37_s12, 256  ;;  %p3697_p1 = scmp.lt.s32.totalorder %s37_s12, %s37_s12 }
   0x8   :  { %p3693_p0 = scmp.ne.s32.totalorder %s37_s12, %s3692_s15  ;;  %p3698_p2 = scmp.lt.s32.totalorder %s3692_s15, %s3692_s15 }
   0xa   :  { %p3699_p3 = por %p3698_p2, %p3697_p1 }
   0xc   :  { %p3700_p4 = pnand %p3699_p3, %p3693_p0 }
   0xe   :  { %3703 = shalt.err (!%p3700_p4)
}
   0xf   :  { %s3772_s16 = smov 128   ;;  %s3773_s17 = smov 8  }
  0x10   :  { %42 = dma.hbm_to_vmem [thread:$0]  %s4411_s1, 256, %s37_s12, [#allocation8], %s3772_s16, %s3772_s16, %s3773_s17  }
  0x11   :  { %s3712_s19 = scalar_lea.vmem %s25_s14, 2048  ;;  %p3717_p6 = scmp.lt.s32.totalorder %s25_s14, %s25_s14 }
  0x12   :  { %p3713_p5 = scmp.ne.s32.totalorder %s25_s14, %s3712_s19  ;;  %p3718_p7 = scmp.lt.s32.totalorder %s3712_s19, %s3712_s19 }
  0x14   :  { %p3719_p8 = por %p3718_p7, %p3717_p6 }
  0x16   :  { %p3720_p9 = pnand %p3719_p8, %p3713_p5 }
  0x18   :  { %3723 = shalt.err (!%p3720_p9)
}
  0x19   :  { %30 = dma.hbm_to_vmem [thread:$0]  %s4410_s0, 2048, %s25_s14, [#allocation6], %s3772_s16, %s3772_s16, %s3773_s17  }
  0x1a   :  { %s3774_s22 = smov [#allocation9]   ;;  %s3775_s24 = smov [#allocation10]  }
  0x1b   :  { %s52_s23 = sshll.u32 %s3774_s22, 4  ;;  %s64_s25 = sshll.u32 %s3775_s24, 4  ;;  %s53_s23 = int_to_ptr.vmem [resolvable:$true] %s52_s23  ;;  %s65_s25 = int_to_ptr.vmem [resolvable:$true] %s64_s25 }
  0x1c   :  { %s3732_s1 = scalar_lea.vmem %s53_s23, 512  ;;  %p3737_p11 = scmp.lt.s32.totalorder %s53_s23, %s53_s23 }
  0x1d   :  { %p3733_p10 = scmp.ne.s32.totalorder %s53_s23, %s3732_s1  ;;  %p3738_p12 = scmp.lt.s32.totalorder %s3732_s1, %s3732_s1 }
  0x1f   :  { %p3739_p13 = por %p3738_p12, %p3737_p11 }
  0x21   :  { %p3740_p0 = pnand %p3739_p13, %p3733_p10 }
  0x23   :  { %3743 = shalt.err (!%p3740_p0)
}
  0x24   :  { %58 = dma.hbm_to_vmem [thread:$0]  %s4414_s4, 512, %s53_s23, [#allocation8], %s3772_s16, %s3772_s16, %s3773_s17  }
  0x25   :  { %s3752_s0 = scalar_lea.vmem %s65_s25, 512  ;;  %p3757_p2 = scmp.lt.s32.totalorder %s65_s25, %s65_s25 }
  0x26   :  { %p3753_p1 = scmp.ne.s32.totalorder %s65_s25, %s3752_s0  ;;  %p3758_p3 = scmp.lt.s32.totalorder %s3752_s0, %s3752_s0 }
  0x28   :  { %p3759_p4 = por %p3758_p3, %p3757_p2 }
  0x2a   :  { %p3760_p5 = pnand %p3759_p4, %p3753_p1 }
  0x2c   :  { %3763 = shalt.err (!%p3760_p5)
}
  0x2d   :  { %70 = dma.hbm_to_vmem [thread:$0]  %s4415_s5, 512, %s65_s25, [#allocation11], %s3772_s16, %s3772_s16, %s3773_s17  }
  0x2e   :  { %3764 = dma.done.wait [#allocation6], 2048  }
  0x2f   :  { %3765 = vsyncadd [#allocation6], 4294965248 }
  0x30   :  { %3766 = dma.done.wait [#allocation8], 768  }
  0x31   :  { %3767 = vsyncadd [#allocation8], 4294966528 }
  0x32   :  { %3768 = dma.done.wait [#allocation11], 512  }
  0x33   :  { %3769 = vsyncadd [#allocation11], 4294966784  ;;  %v3776_v1 = vmov 0.0   ;;  %v106_v2 = vld [vmem:[#allocation7 + $0x8] sm:$0xff]  ;;  %v3860_v3 = vld [vmem:[%s4412_s2 + $0x18] sm:$0xff]  ;;  %vm114_vm0 = vcmask 130048  }
  0x34   :  { %3207 = vmatprep.mubr.f32.mxu1 %v3776_v1  ;;  %v105_v4 = vld [vmem:[#allocation7] sm:$0xff]  ;;  %3171 = vmatprep.subr.mxu0 %v106_v2  ;;  %v3866_v5 = vld [vmem:[%s4412_s2 + $0x10] sm:$0xff]  ;;  %v3909_v11 = vld [vmem:[%s4413_s3] ss:$0 sm:$0xff]  ;;  %s3777_s16 = smov 64   ;;  %s3778_s17 = smov 32  }
  0x35   :  { %3199 = vmatprep.subr.mxu1 %v3860_v3  ;;  %v89_v6 = vld [vmem:[#allocation5] sm:$0xff]  ;;  %3172 = vmatpush3.msra.mxu0 %v106_v2  ;;  %v90_v7 = vld [vmem:[#allocation5 + $0x8] sm:$0xff]  ;;  %v91_v39 = vld [vmem:[#allocation5 + $0x10] sm:$0xff]  ;;  %vm330_vm1 = vcmask 261120   ;;  %vm2924_vm2 = vcmask 7168  }
  0x36   :  { %3200 = vmatpush3.msra.mxu1 %v3860_v3  ;;  %3173 = vmatprep.subr.mxu0 %v105_v4  ;;  %v3873_v8 = vld [vmem:[%s4412_s2 + $0x8] sm:$0xff]  ;;  %v3881_v9 = vld [vmem:[%s4412_s2] sm:$0xff] }
  0x37   :  { %3201 = vmatprep.subr.mxu1 %v3866_v5  ;;  %3174 = vmatpush3.msra.mxu0 %v105_v4  ;;  %v92_v42 = vld [vmem:[#allocation5 + $0x18] sm:$0xff] }
  0x38   :  { %3175 = vmatprep.mubr.msk.f32.mxu0 %vm114_vm0, %v89_v6  ;;  %3202 = vmatpush3.msra.mxu1 %v3866_v5 }
  0x39   :  { %3176 = vmatmul.mubr.msk.f32.vlgmr.msra.gmra.mxu0 %vm114_vm0, %v90_v7  ;;  %3203 = vmatprep.subr.mxu1 %v3873_v8 }
  0x3a   :  { %3243 = vmatprep.subr.mxu0 %v3860_v3  ;;  %3204 = vmatpush3.msra.mxu1 %v3873_v8 }
  0x3b   :  { %3244 = vmatpush3.msra.mxu0 %v3860_v3  ;;  %3205 = vmatprep.subr.mxu1 %v3881_v9 }
  0x3c   :  { %3245 = vmatprep.subr.mxu0 %v3866_v5  ;;  %3206 = vmatpush3.msra.mxu1 %v3881_v9 }
  0x3d   :  { %3246 = vmatpush3.msra.mxu0 %v3866_v5  ;;  %3208 = vmatmul.mubr.f32.vlgmr.msra.gmra.mxu1 %v3776_v1 }
  0x3e   :  { %3210 = vmatprep.subr.mxu1 %v3860_v3  ;;  %3247 = vmatprep.subr.mxu0 %v3873_v8 }
  0x3f   :  { %3211 = vmatpush3.msra.mxu1 %v3860_v3  ;;  %3248 = vmatpush3.msra.mxu0 %v3873_v8 }
  0x40   :  { %3212 = vmatprep.subr.mxu1 %v3866_v5  ;;  %3249 = vmatprep.subr.mxu0 %v3881_v9 }
  0x41   :  { %3213 = vmatpush3.msra.mxu1 %v3866_v5  ;;  %3250 = vmatpush3.msra.mxu0 %v3881_v9 }
  0x42   :  { %3214 = vmatprep.subr.mxu1 %v3873_v8  ;;  %3265 = vmatprep.subr.mxu0 %v3860_v3 }
  0x43   :  { %3215 = vmatpush3.msra.mxu1 %v3873_v8  ;;  %3178 = vmatprep.mubr.msk.f32.mxu0 %vm114_vm0, %v91_v39 }
  0x44   :  { %3216 = vmatprep.subr.mxu1 %v3881_v9  ;;  %3179 = vmatmul.mubr.msk.f32.gmra.mxu0 %vm114_vm0, %v92_v42 }
  0x45   :  { %3217 = vmatpush3.msra.mxu1 %v3881_v9 }
  0x46   :  { %3221 = vmatprep.subr.mxu1 %v3860_v3 }
  0xf9   :  { %v3177_v10 = vpop.f32.mrf.mxu0 }
  0xfa   :  { %v235_v15 = vadd.f32 %v3177_v10, %v3909_v11 }
  0xfb   :  { %v229_v12 = vpop.f32.mrf.mxu0 }
  0xfc   :  { %v230_v14 = vadd.f32 %v3909_v11, %v229_v12 }
  0xfd   :  { %v3209_v13 = vpop.f32.mrf.mxu1 }
  0xfe   :  { %v410_v18 = vadd.f32 %v3209_v13, %v235_v15 }
  0xff   :  { %v400_v16 = vpop.f32.mrf.mxu1 }
 0x100   :  { %v409_v17 = vadd.f32 %v400_v16, %v230_v14  ;;  %v2952_v22 = vmul.f32 -1.442695, %v410_v18 }
 0x102   :  { %3427 = vtanh.f32 %v409_v17  ;;  %v2951_v21 = vmul.f32 -1.442695, %v409_v17 }
 0x103   :  { %3429 = vtanh.f32 %v410_v18 }
 0x104   :  { %3431 = vpow2.f32 %v2951_v21  ;;  %v3180_v49 = vpop.f32.mrf.mxu0 }
 0x105   :  { %3433 = vpow2.f32 %v2952_v22  ;;  %v245_v50 = vadd.f32 %v3180_v49, %v3909_v11 }
 0x106   :  { %v239_v51 = vpop.f32.mrf.mxu0 }
 0x107   :  { %v240_v53 = vadd.f32 %v3909_v11, %v239_v51 }
 0x10f   :  { %v3428_v19 = vpop.eup %3427 }
 0x110   :  { %429 = vrot.lane.b32.xlu0 %v3428_v19, %s3777_s16  ;;  %v3430_v20 = vpop.eup %3429  ;;  %v93_v19 = vld [vmem:[#allocation5 + $0x20] sm:$0xff] }
 0x111   :  { %v3432_v23 = vpop.eup %3431  ;;  %3181 = vmatprep.mubr.msk.f32.mxu0 %vm114_vm0, %v93_v19 }
 0x112   :  { %v417_v24 = vadd.f32 1.0, %v3432_v23  ;;  %v3434_v25 = vpop.eup %3433 }
 0x113   :  { %v418_v26 = vadd.f32 1.0, %v3434_v25 }
 0x114   :  { %431 = vrot.lane.b32.xlu0 %v3430_v20, %s3777_s16  ;;  %3435 = vrcp.f32 %v417_v24  ;;  %v94_v20 = vld [vmem:[#allocation5 + $0x28] sm:$0xff] }
 0x115   :  { %3437 = vrcp.f32 %v418_v26  ;;  %3182 = vmatmul.mubr.msk.f32.gmra.mxu0 %vm114_vm0, %v94_v20 }
 0x121   :  { %v3436_v27 = vpop.eup %3435 }
 0x122   :  { %v3438_v30 = vpop.eup %3437  ;;  %v425_v33 = vmul.f32 0.0, %v3436_v27 }
 0x123   :  { %v426_v36 = vmul.f32 0.0, %v3438_v30 }
 0x182   :  { %v430_v28 = vpop.permute.xlu0 %429 }
 0x183   :  { %v435_v29 = vmul.f32 %v3436_v27, %v430_v28 }
 0x185   :  { %439 = vrot.lane.b32.xlu1 %v435_v29, %s3778_s17 }
 0x186   :  { %v432_v31 = vpop.permute.xlu0 %431 }
 0x187   :  { %v436_v32 = vmul.f32 %v3438_v30, %v432_v31 }
 0x189   :  { %441 = vrot.lane.b32.xlu1 %v436_v32, %s3778_s17 }
 0x1d5   :  { %v3183_v29 = vpop.f32.mrf.mxu0 }
 0x1d7   :  { %v249_v31 = vpop.f32.mrf.mxu0 }
 0x1f7   :  { %v440_v34 = vpop.permute.xlu1 %439 }
 0x1f8   :  { %v3917_v35 = vadd.f32 %v440_v34, %v425_v33  ;;  %v250_v33 = vadd.f32 %v3909_v11, %v249_v31 }
 0x1fa   :  { %3439 = vtanh.f32 %v3917_v35 }
 0x1fb   :  { %v442_v37 = vpop.permute.xlu1 %441 }
 0x1fc   :  { %v3920_v38 = vadd.f32 %v442_v37, %v426_v36 }
 0x1fe   :  { %3441 = vtanh.f32 %v3920_v38 }
 0x207   :  { %v3440_v40 = vpop.eup %3439 }
 0x208   :  { %451 = vrot.lane.b32.xlu0 %v3440_v40, %s3777_s16 }
 0x20b   :  { %v3442_v41 = vpop.eup %3441 }
 0x20c   :  { %453 = vrot.lane.b32.xlu1 %v3442_v41, %s3777_s16 }
 0x27a   :  { %v452_v43 = vpop.permute.xlu0 %451 }
 0x27b   :  { %v457_v44 = vmul.f32 %v3436_v27, %v452_v43 }
 0x27d   :  { %461 = vrot.lane.b32.xlu0 %v457_v44, %s3778_s17 }
 0x27e   :  { %v454_v45 = vpop.permute.xlu1 %453 }
 0x27f   :  { %v458_v46 = vmul.f32 %v3438_v30, %v454_v45  ;;  %v255_v30 = vadd.f32 %v3183_v29, %v3909_v11 }
 0x281   :  { %463 = vrot.lane.b32.xlu1 %v458_v46, %s3778_s17 }
 0x2ef   :  { %v462_v47 = vpop.permute.xlu0 %461 }
 0x2f0   :  { %467 = vst.msk [vmem:[#allocation3] sm:$0xff] %vm330_vm1, %v462_v47  ;;  %3218 = vmatprep.mubr.msk.f32.mxu1 %vm330_vm1, %v462_v47 }
 0x2f3   :  { %v464_v48 = vpop.permute.xlu1 %463 }
 0x2f4   :  { %468 = vst.msk [vmem:[#allocation3 + $0x8] sm:$0xff] %vm330_vm1, %v464_v48  ;;  %3219 = vmatmul.mubr.msk.f32.vlgmr.msra.gmra.mxu1 %vm330_vm1, %v464_v48 }
 0x2f5   :  { %3222 = vmatpush3.msra.mxu1 %v3860_v3 }
 0x2f6   :  { %3223 = vmatprep.subr.mxu1 %v3866_v5 }
 0x2f7   :  { %3224 = vmatpush3.msra.mxu1 %v3866_v5 }
 0x2f8   :  { %3225 = vmatprep.subr.mxu1 %v3873_v8 }
 0x2f9   :  { %3226 = vmatpush3.msra.mxu1 %v3873_v8 }
 0x2fa   :  { %3227 = vmatprep.subr.mxu1 %v3881_v9 }
 0x2fb   :  { %3228 = vmatpush3.msra.mxu1 %v3881_v9 }
 0x2fc   :  { %3232 = vmatprep.subr.mxu1 %v3860_v3 }
 0x3b4   :  { %v3220_v52 = vpop.f32.mrf.mxu1 }
 0x3b5   :  { %v552_v54 = vadd.f32 %v3220_v52, %v245_v50 }
 0x3b6   :  { %v542_v55 = vpop.f32.mrf.mxu1 }
 0x3b7   :  { %3443 = vtanh.f32 %v552_v54  ;;  %v551_v56 = vadd.f32 %v542_v55, %v240_v53  ;;  %v2956_v59 = vmul.f32 -1.442695, %v552_v54 }
 0x3b9   :  { %3445 = vtanh.f32 %v551_v56  ;;  %v2955_v60 = vmul.f32 -1.442695, %v551_v56 }
 0x3ba   :  { %3447 = vpow2.f32 %v2956_v59 }
 0x3bb   :  { %3449 = vpow2.f32 %v2955_v60 }
 0x3c4   :  { %v3444_v57 = vpop.eup %3443 }
 0x3c5   :  { %573 = vrot.lane.b32.xlu1 %v3444_v57, %s3777_s16  ;;  %v95_v57 = vld [vmem:[#allocation5 + $0x30] sm:$0xff] }
 0x3c6   :  { %v3446_v58 = vpop.eup %3445  ;;  %3184 = vmatprep.mubr.msk.f32.mxu0 %vm114_vm0, %v95_v57 }
 0x3c7   :  { %571 = vrot.lane.b32.xlu0 %v3446_v58, %s3777_s16  ;;  %v3448_v61 = vpop.eup %3447  ;;  %v96_v58 = vld [vmem:[#allocation5 + $0x38] sm:$0xff] }
 0x3c8   :  { %v3450_v62 = vpop.eup %3449  ;;  %v560_v63 = vadd.f32 1.0, %v3448_v61  ;;  %3185 = vmatmul.mubr.msk.f32.gmra.mxu0 %vm114_vm0, %v96_v58 }
 0x3c9   :  { %v559_v0 = vadd.f32 1.0, %v3450_v62 }
 0x3ca   :  { %3451 = vrcp.f32 %v560_v63 }
 0x3cb   :  { %3453 = vrcp.f32 %v559_v0 }
 0x3d7   :  { %v3452_v2 = vpop.eup %3451 }
 0x3d8   :  { %v3454_v7 = vpop.eup %3453  ;;  %v568_v13 = vmul.f32 %v3452_v2, %v3920_v38 }
 0x3d9   :  { %v567_v16 = vmul.f32 %v3454_v7, %v3917_v35 }
 0x437   :  { %v574_v4 = vpop.permute.xlu1 %573 }
 0x438   :  { %v578_v6 = vmul.f32 %v3452_v2, %v574_v4 }
 0x439   :  { %v572_v10 = vpop.permute.xlu0 %571 }
 0x43a   :  { %583 = vrot.lane.b32.xlu1 %v578_v6, %s3778_s17  ;;  %v577_v12 = vmul.f32 %v3454_v7, %v572_v10 }
 0x43c   :  { %581 = vrot.lane.b32.xlu0 %v577_v12, %s3778_s17 }
 0x488   :  { %v3186_v6 = vpop.f32.mrf.mxu0 }
 0x48a   :  { %v259_v10 = vpop.f32.mrf.mxu0 }
 0x4ac   :  { %v584_v14 = vpop.permute.xlu1 %583 }
 0x4ad   :  { %v3948_v15 = vadd.f32 %v584_v14, %v568_v13  ;;  %v260_v13 = vadd.f32 %v3909_v11, %v259_v10 }
 0x4ae   :  { %v582_v17 = vpop.permute.xlu0 %581 }
 0x4af   :  { %3455 = vtanh.f32 %v3948_v15  ;;  %v3952_v18 = vadd.f32 %v582_v17, %v567_v16 }
 0x4b1   :  { %3457 = vtanh.f32 %v3952_v18 }
 0x4bc   :  { %v3456_v21 = vpop.eup %3455 }
 0x4bd   :  { %595 = vrot.lane.b32.xlu1 %v3456_v21, %s3777_s16 }
 0x4be   :  { %v3458_v22 = vpop.eup %3457 }
 0x4bf   :  { %593 = vrot.lane.b32.xlu0 %v3458_v22, %s3777_s16 }
 0x52f   :  { %v596_v23 = vpop.permute.xlu1 %595 }
 0x530   :  { %v600_v24 = vmul.f32 %v3452_v2, %v596_v23 }
 0x531   :  { %v594_v25 = vpop.permute.xlu0 %593 }
 0x532   :  { %605 = vrot.lane.b32.xlu1 %v600_v24, %s3778_s17  ;;  %v599_v26 = vmul.f32 %v3454_v7, %v594_v25  ;;  %v265_v7 = vadd.f32 %v3186_v6, %v3909_v11 }
 0x534   :  { %603 = vrot.lane.b32.xlu0 %v599_v26, %s3778_s17 }
 0x5a4   :  { %v606_v27 = vpop.permute.xlu1 %605 }
 0x5a5   :  { %611 = vst.msk [vmem:[#allocation3 + $0x18] sm:$0xff] %vm330_vm1, %v606_v27 }
 0x5a6   :  { %v604_v28 = vpop.permute.xlu0 %603 }
 0x5a7   :  { %610 = vst.msk [vmem:[#allocation3 + $0x10] sm:$0xff] %vm330_vm1, %v604_v28  ;;  %3229 = vmatprep.mubr.msk.f32.mxu1 %vm330_vm1, %v604_v28 }
 0x5a8   :  { %3230 = vmatmul.mubr.msk.f32.vlgmr.msra.gmra.mxu1 %vm330_vm1, %v606_v27 }
 0x5a9   :  { %3233 = vmatpush3.msra.mxu1 %v3860_v3 }
 0x5aa   :  { %3234 = vmatprep.subr.mxu1 %v3866_v5 }
 0x5ab   :  { %3235 = vmatpush3.msra.mxu1 %v3866_v5 }
 0x5ac   :  { %3236 = vmatprep.subr.mxu1 %v3873_v8 }
 0x5ad   :  { %3237 = vmatpush3.msra.mxu1 %v3873_v8 }
 0x5ae   :  { %3238 = vmatprep.subr.mxu1 %v3881_v9 }
 0x5af   :  { %3239 = vmatpush3.msra.mxu1 %v3881_v9 }
 0x5b0   :  { %3254 = vmatprep.subr.mxu1 %v3860_v3 }
 0x668   :  { %v3231_v32 = vpop.f32.mrf.mxu1 }
 0x669   :  { %v695_v34 = vadd.f32 %v3231_v32, %v255_v30 }
 0x66a   :  { %v685_v35 = vpop.f32.mrf.mxu1 }
 0x66b   :  { %3459 = vtanh.f32 %v695_v34  ;;  %v694_v36 = vadd.f32 %v685_v35, %v250_v33  ;;  %v2960_v39 = vmul.f32 -1.442695, %v695_v34 }
 0x66d   :  { %3461 = vtanh.f32 %v694_v36  ;;  %v2959_v40 = vmul.f32 -1.442695, %v694_v36 }
 0x66e   :  { %3463 = vpow2.f32 %v2960_v39  ;;  %v99_v39 = vld [vmem:[#allocation5 + $0x50] sm:$0xff] }
 0x66f   :  { %3465 = vpow2.f32 %v2959_v40  ;;  %v100_v40 = vld [vmem:[#allocation5 + $0x58] sm:$0xff] }
 0x678   :  { %v3460_v37 = vpop.eup %3459 }
 0x679   :  { %716 = vrot.lane.b32.xlu1 %v3460_v37, %s3777_s16  ;;  %v97_v37 = vld [vmem:[#allocation5 + $0x40] sm:$0xff] }
 0x67a   :  { %v3462_v38 = vpop.eup %3461  ;;  %3187 = vmatprep.mubr.msk.f32.mxu0 %vm114_vm0, %v97_v37 }
 0x67b   :  { %714 = vrot.lane.b32.xlu0 %v3462_v38, %s3777_s16  ;;  %v3464_v41 = vpop.eup %3463  ;;  %v98_v38 = vld [vmem:[#allocation5 + $0x48] sm:$0xff] }
 0x67c   :  { %v3466_v42 = vpop.eup %3465  ;;  %v703_v43 = vadd.f32 1.0, %v3464_v41  ;;  %3188 = vmatmul.mubr.msk.f32.gmra.mxu0 %vm114_vm0, %v98_v38  ;;  %v101_v41 = vld [vmem:[#allocation5 + $0x60] sm:$0xff] }
 0x67d   :  { %v702_v44 = vadd.f32 1.0, %v3466_v42  ;;  %3190 = vmatprep.mubr.msk.f32.mxu0 %vm114_vm0, %v99_v39 }
 0x67e   :  { %3467 = vrcp.f32 %v703_v43  ;;  %v102_v43 = vld [vmem:[#allocation5 + $0x68] sm:$0xff] }
 0x67f   :  { %3469 = vrcp.f32 %v702_v44  ;;  %v103_v44 = vld [vmem:[#allocation5 + $0x70] sm:$0xff] }
 0x680   :  { %3191 = vmatmul.mubr.msk.f32.gmra.mxu0 %vm114_vm0, %v100_v40 }
 0x681   :  { %3193 = vmatprep.mubr.msk.f32.mxu0 %vm114_vm0, %v101_v41 }
 0x684   :  { %3194 = vmatmul.mubr.msk.f32.gmra.mxu0 %vm114_vm0, %v102_v43 }
 0x685   :  { %3196 = vmatprep.mubr.msk.f32.mxu0 %vm114_vm0, %v103_v44 }
 0x68b   :  { %v3468_v45 = vpop.eup %3467 }
 0x68c   :  { %v3470_v48 = vpop.eup %3469  ;;  %v711_v51 = vmul.f32 %v3468_v45, %v3948_v15 }
 0x68d   :  { %v710_v54 = vmul.f32 %v3470_v48, %v3952_v18 }
 0x6eb   :  { %v717_v46 = vpop.permute.xlu1 %716 }
 0x6ec   :  { %v721_v47 = vmul.f32 %v3468_v45, %v717_v46  ;;  %v104_v46 = vld [vmem:[#allocation5 + $0x78] sm:$0xff] }
 0x6ed   :  { %v715_v49 = vpop.permute.xlu0 %714  ;;  %3197 = vmatmul.mubr.msk.f32.gmra.mxu0 %vm114_vm0, %v104_v46 }
 0x6ee   :  { %726 = vrot.lane.b32.xlu1 %v721_v47, %s3778_s17  ;;  %v720_v50 = vmul.f32 %v3470_v48, %v715_v49 }
 0x6f0   :  { %724 = vrot.lane.b32.xlu0 %v720_v50, %s3778_s17 }
 0x760   :  { %v727_v52 = vpop.permute.xlu1 %726 }
 0x761   :  { %v3980_v53 = vadd.f32 %v727_v52, %v711_v51 }
 0x762   :  { %v725_v55 = vpop.permute.xlu0 %724 }
 0x763   :  { %3471 = vtanh.f32 %v3980_v53  ;;  %v3984_v56 = vadd.f32 %v725_v55, %v710_v54 }
 0x765   :  { %3473 = vtanh.f32 %v3984_v56 }
 0x770   :  { %v3472_v59 = vpop.eup %3471 }
 0x771   :  { %738 = vrot.lane.b32.xlu1 %v3472_v59, %s3777_s16 }
 0x772   :  { %v3474_v60 = vpop.eup %3473 }
 0x773   :  { %736 = vrot.lane.b32.xlu0 %v3474_v60, %s3777_s16 }
 0x7e3   :  { %v739_v61 = vpop.permute.xlu1 %738 }
 0x7e4   :  { %v743_v62 = vmul.f32 %v3468_v45, %v739_v61 }
 0x7e5   :  { %v737_v63 = vpop.permute.xlu0 %736 }
 0x7e6   :  { %748 = vrot.lane.b32.xlu1 %v743_v62, %s3778_s17  ;;  %v742_v0 = vmul.f32 %v3470_v48, %v737_v63 }
 0x7e8   :  { %746 = vrot.lane.b32.xlu0 %v742_v0, %s3778_s17 }
 0x858   :  { %v749_v2 = vpop.permute.xlu1 %748 }
 0x859   :  { %754 = vst.msk [vmem:[#allocation3 + $0x28] sm:$0xff] %vm330_vm1, %v749_v2 }
 0x85a   :  { %v747_v4 = vpop.permute.xlu0 %746 }
 0x85b   :  { %753 = vst.msk [vmem:[#allocation3 + $0x20] sm:$0xff] %vm330_vm1, %v747_v4  ;;  %3240 = vmatprep.mubr.msk.f32.mxu1 %vm330_vm1, %v747_v4 }
 0x85c   :  { %3241 = vmatmul.mubr.msk.f32.vlgmr.msra.gmra.mxu1 %vm330_vm1, %v749_v2 }
 0x85d   :  { %3255 = vmatpush3.msra.mxu1 %v3860_v3 }
 0x85e   :  { %3256 = vmatprep.subr.mxu1 %v3866_v5 }
 0x85f   :  { %3257 = vmatpush3.msra.mxu1 %v3866_v5 }
 0x860   :  { %3258 = vmatprep.subr.mxu1 %v3873_v8 }
 0x861   :  { %3259 = vmatpush3.msra.mxu1 %v3873_v8 }
 0x862   :  { %3260 = vmatprep.subr.mxu1 %v3881_v9 }
 0x863   :  { %3261 = vmatpush3.msra.mxu1 %v3881_v9 }
 0x864   :  { %3276 = vmatprep.subr.mxu1 %v3860_v3 }
 0x91c   :  { %v3242_v12 = vpop.f32.mrf.mxu1 }
 0x91d   :  { %v838_v14 = vadd.f32 %v3242_v12, %v265_v7 }
 0x91e   :  { %v828_v15 = vpop.f32.mrf.mxu1 }
 0x91f   :  { %3475 = vtanh.f32 %v838_v14  ;;  %v837_v16 = vadd.f32 %v828_v15, %v260_v13  ;;  %v2964_v19 = vmul.f32 -1.442695, %v838_v14 }
 0x921   :  { %3477 = vtanh.f32 %v837_v16  ;;  %v2963_v20 = vmul.f32 -1.442695, %v837_v16 }
 0x922   :  { %3479 = vpow2.f32 %v2964_v19 }
 0x923   :  { %3481 = vpow2.f32 %v2963_v20 }
 0x92c   :  { %v3476_v17 = vpop.eup %3475 }
 0x92d   :  { %859 = vrot.lane.b32.xlu1 %v3476_v17, %s3777_s16 }
 0x92e   :  { %v3478_v18 = vpop.eup %3477 }
 0x92f   :  { %857 = vrot.lane.b32.xlu0 %v3478_v18, %s3777_s16  ;;  %v3480_v21 = vpop.eup %3479 }
 0x930   :  { %v3482_v22 = vpop.eup %3481  ;;  %v846_v23 = vadd.f32 1.0, %v3480_v21 }
 0x931   :  { %v845_v24 = vadd.f32 1.0, %v3482_v22 }
 0x932   :  { %3483 = vrcp.f32 %v846_v23 }
 0x933   :  { %3485 = vrcp.f32 %v845_v24 }
 0x93f   :  { %v3484_v25 = vpop.eup %3483 }
 0x940   :  { %v3486_v28 = vpop.eup %3485  ;;  %v854_v31 = vmul.f32 %v3484_v25, %v3980_v53  ;;  %v3189_v53 = vpop.f32.mrf.mxu0 }
 0x941   :  { %v853_v34 = vmul.f32 %v3486_v28, %v3984_v56  ;;  %v275_v61 = vadd.f32 %v3189_v53, %v3909_v11 }
 0x942   :  { %v269_v54 = vpop.f32.mrf.mxu0 }
 0x943   :  { %v270_v63 = vadd.f32 %v3909_v11, %v269_v54 }
 0x944   :  { %v4042_v55 = vpop.f32.mrf.mxu0 }
 0x945   :  { %v285_v37 = vadd.f32 %v4042_v55, %v3909_v11 }
 0x946   :  { %v4044_v56 = vpop.f32.mrf.mxu0 }
 0x947   :  { %v280_v39 = vadd.f32 %v3909_v11, %v4044_v56 }
 0x948   :  { %v4046_v57 = vpop.f32.mrf.mxu0 }
 0x94a   :  { %v4048_v58 = vpop.f32.mrf.mxu0 }
 0x94c   :  { %v4050_v59 = vpop.f32.mrf.mxu0 }
 0x94e   :  { %v4052_v60 = vpop.f32.mrf.mxu0 }
 0x99f   :  { %v860_v26 = vpop.permute.xlu1 %859 }
 0x9a0   :  { %v864_v27 = vmul.f32 %v3484_v25, %v860_v26 }
 0x9a1   :  { %v858_v29 = vpop.permute.xlu0 %857 }
 0x9a2   :  { %869 = vrot.lane.b32.xlu1 %v864_v27, %s3778_s17  ;;  %v863_v30 = vmul.f32 %v3486_v28, %v858_v29 }
 0x9a4   :  { %867 = vrot.lane.b32.xlu0 %v863_v30, %s3778_s17 }
 0xa14   :  { %v870_v32 = vpop.permute.xlu1 %869 }
 0xa15   :  { %v4012_v33 = vadd.f32 %v870_v32, %v854_v31 }
 0xa16   :  { %v868_v35 = vpop.permute.xlu0 %867 }
 0xa17   :  { %3487 = vtanh.f32 %v4012_v33  ;;  %v4016_v36 = vadd.f32 %v868_v35, %v853_v34 }
 0xa19   :  { %3489 = vtanh.f32 %v4016_v36 }
 0xa24   :  { %v3488_v42 = vpop.eup %3487 }
 0xa25   :  { %881 = vrot.lane.b32.xlu1 %v3488_v42, %s3777_s16 }
 0xa26   :  { %v3490_v45 = vpop.eup %3489 }
 0xa27   :  { %879 = vrot.lane.b32.xlu0 %v3490_v45, %s3777_s16 }
 0xa97   :  { %v882_v47 = vpop.permute.xlu1 %881 }
 0xa98   :  { %v886_v48 = vmul.f32 %v3484_v25, %v882_v47 }
 0xa99   :  { %v880_v49 = vpop.permute.xlu0 %879 }
 0xa9a   :  { %891 = vrot.lane.b32.xlu1 %v886_v48, %s3778_s17  ;;  %v885_v50 = vmul.f32 %v3486_v28, %v880_v49 }
 0xa9c   :  { %889 = vrot.lane.b32.xlu0 %v885_v50, %s3778_s17 }
 0xb0c   :  { %v892_v51 = vpop.permute.xlu1 %891 }
 0xb0d   :  { %897 = vst.msk [vmem:[#allocation3 + $0x38] sm:$0xff] %vm330_vm1, %v892_v51 }
 0xb0e   :  { %v890_v52 = vpop.permute.xlu0 %889 }
 0xb0f   :  { %896 = vst.msk [vmem:[#allocation3 + $0x30] sm:$0xff] %vm330_vm1, %v890_v52  ;;  %3251 = vmatprep.mubr.msk.f32.mxu0 %vm330_vm1, %v890_v52 }
 0xb10   :  { %3252 = vmatmul.mubr.msk.f32.vlgmr.msra.gmra.mxu0 %vm330_vm1, %v892_v51 }
 0xb11   :  { %3266 = vmatpush3.msra.mxu0 %v3860_v3 }
 0xb12   :  { %3267 = vmatprep.subr.mxu0 %v3866_v5 }
 0xb13   :  { %3268 = vmatpush3.msra.mxu0 %v3866_v5 }
 0xb14   :  { %3269 = vmatprep.subr.mxu0 %v3873_v8 }
 0xb15   :  { %3270 = vmatpush3.msra.mxu0 %v3873_v8 }
 0xb16   :  { %3271 = vmatprep.subr.mxu0 %v3881_v9 }
 0xb17   :  { %3272 = vmatpush3.msra.mxu0 %v3881_v9 }
 0xbd0   :  { %v3253_v62 = vpop.f32.mrf.mxu0 }
 0xbd1   :  { %v981_v0 = vadd.f32 %v3253_v62, %v275_v61 }
 0xbd2   :  { %v971_v2 = vpop.f32.mrf.mxu0 }
 0xbd3   :  { %3491 = vtanh.f32 %v981_v0  ;;  %v980_v4 = vadd.f32 %v971_v2, %v270_v63  ;;  %v2968_v10 = vmul.f32 -1.442695, %v981_v0  ;;  %v1489_v2 = vld [vmem:[#allocation9 + $0x18] sm:$0xff] }
 0xbd4   :  { %3287 = vmatprep.subr.mxu0 %v1489_v2 }
 0xbd5   :  { %3493 = vtanh.f32 %v980_v4  ;;  %v2967_v12 = vmul.f32 -1.442695, %v980_v4 }
 0xbd6   :  { %3495 = vpow2.f32 %v2968_v10 }
 0xbd7   :  { %3497 = vpow2.f32 %v2967_v12 }
 0xbe0   :  { %v3492_v6 = vpop.eup %3491 }
 0xbe1   :  { %1002 = vrot.lane.b32.xlu1 %v3492_v6, %s3777_s16 }
 0xbe2   :  { %v3494_v7 = vpop.eup %3493 }
 0xbe3   :  { %1000 = vrot.lane.b32.xlu0 %v3494_v7, %s3777_s16  ;;  %v3496_v13 = vpop.eup %3495 }
 0xbe4   :  { %v3498_v14 = vpop.eup %3497  ;;  %v989_v15 = vadd.f32 1.0, %v3496_v13 }
 0xbe5   :  { %v988_v16 = vadd.f32 1.0, %v3498_v14  ;;  %v1488_v14 = vld [vmem:[#allocation9 + $0x10] sm:$0xff] }
 0xbe6   :  { %3499 = vrcp.f32 %v989_v15  ;;  %v1470_v15 = vld [vmem:[#allocation3] sm:$0xff] }
 0xbe7   :  { %3501 = vrcp.f32 %v988_v16  ;;  %v1487_v16 = vld [vmem:[#allocation9 + $0x8] sm:$0xff] }
 0xbf3   :  { %v3500_v17 = vpop.eup %3499 }
 0xbf4   :  { %v3502_v20 = vpop.eup %3501  ;;  %v997_v23 = vmul.f32 %v3500_v17, %v4012_v33 }
 0xbf5   :  { %v996_v26 = vmul.f32 %v3502_v20, %v4016_v36 }
 0xc53   :  { %v1003_v18 = vpop.permute.xlu1 %1002 }
 0xc54   :  { %v1007_v19 = vmul.f32 %v3500_v17, %v1003_v18  ;;  %v1471_v18 = vld [vmem:[#allocation3 + $0x8] sm:$0xff] }
 0xc55   :  { %v1001_v21 = vpop.permute.xlu0 %1000 }
 0xc56   :  { %1012 = vrot.lane.b32.xlu1 %v1007_v19, %s3778_s17  ;;  %v1006_v22 = vmul.f32 %v3502_v20, %v1001_v21  ;;  %v1472_v19 = vld [vmem:[#allocation3 + $0x10] sm:$0xff]  ;;  %v1474_v21 = vld [vmem:[#allocation3 + $0x20] sm:$0xff] }
 0xc58   :  { %1010 = vrot.lane.b32.xlu0 %v1006_v22, %s3778_s17  ;;  %v1475_v22 = vld [vmem:[#allocation3 + $0x28] sm:$0xff] }
 0xcc8   :  { %v1013_v24 = vpop.permute.xlu1 %1012 }
 0xcc9   :  { %v1017_v25 = vadd.f32 %v1013_v24, %v997_v23  ;;  %v1476_v23 = vld [vmem:[#allocation3 + $0x30] sm:$0xff]  ;;  %v1477_v24 = vld [vmem:[#allocation3 + $0x38] sm:$0xff] }
 0xcca   :  { %v1011_v27 = vpop.permute.xlu0 %1010 }
 0xccb   :  { %3503 = vtanh.f32 %v1017_v25  ;;  %v1016_v28 = vadd.f32 %v1011_v27, %v996_v26 }
 0xccd   :  { %3505 = vtanh.f32 %v1016_v28 }
 0xcd8   :  { %v3504_v29 = vpop.eup %3503 }
 0xcd9   :  { %1024 = vrot.lane.b32.xlu1 %v3504_v29, %s3777_s16  ;;  %v295_v29 = vadd.f32 %v4046_v57, %v3909_v11 }
 0xcda   :  { %v3506_v30 = vpop.eup %3505 }
 0xcdb   :  { %1022 = vrot.lane.b32.xlu0 %v3506_v30, %s3777_s16 }
 0xd4b   :  { %v1025_v31 = vpop.permute.xlu1 %1024 }
 0xd4c   :  { %v1029_v32 = vmul.f32 %v3500_v17, %v1025_v31  ;;  %v1486_v17 = vld [vmem:[#allocation9] sm:$0xff]  ;;  %v290_v31 = vadd.f32 %v3909_v11, %v4048_v58 }
 0xd4d   :  { %v1023_v34 = vpop.permute.xlu0 %1022 }
 0xd4e   :  { %1034 = vrot.lane.b32.xlu1 %v1029_v32, %s3778_s17  ;;  %v1028_v33 = vmul.f32 %v3502_v20, %v1023_v34  ;;  %v1473_v20 = vld [vmem:[#allocation3 + $0x18] sm:$0xff] }
 0xd50   :  { %1032 = vrot.lane.b32.xlu0 %v1028_v33, %s3778_s17 }
 0xdc0   :  { %v1035_v35 = vpop.permute.xlu1 %1034 }
 0xdc1   :  { %1040 = vst.msk [vmem:[#allocation3 + $0x48] sm:$0xff] %vm330_vm1, %v1035_v35 }
 0xdc2   :  { %v1033_v36 = vpop.permute.xlu0 %1032 }
 0xdc3   :  { %1039 = vst.msk [vmem:[#allocation3 + $0x40] sm:$0xff] %vm330_vm1, %v1033_v36  ;;  %3262 = vmatprep.mubr.msk.f32.mxu1 %vm330_vm1, %v1033_v36 }
 0xdc4   :  { %3263 = vmatmul.mubr.msk.f32.vlgmr.msra.gmra.mxu1 %vm330_vm1, %v1035_v35 }
 0xdc5   :  { %3277 = vmatpush3.msra.mxu1 %v3860_v3 }
 0xdc6   :  { %3278 = vmatprep.subr.mxu1 %v3866_v5 }
 0xdc7   :  { %3279 = vmatpush3.msra.mxu1 %v3866_v5 }
 0xdc8   :  { %3280 = vmatprep.subr.mxu1 %v3873_v8  ;;  %v1479_v26 = vld [vmem:[#allocation3 + $0x48] sm:$0xff] }
 0xdc9   :  { %3281 = vmatpush3.msra.mxu1 %v3873_v8 }
 0xdca   :  { %3282 = vmatprep.subr.mxu1 %v3881_v9 }
 0xdcb   :  { %3283 = vmatpush3.msra.mxu1 %v3881_v9 }
 0xe84   :  { %v3264_v38 = vpop.f32.mrf.mxu1 }
 0xe85   :  { %v1124_v3 = vadd.f32 %v3264_v38, %v285_v37 }
 0xe86   :  { %v1114_v40 = vpop.f32.mrf.mxu1 }
 0xe87   :  { %3507 = vtanh.f32 %v1124_v3  ;;  %v1123_v41 = vadd.f32 %v1114_v40, %v280_v39  ;;  %v2972_v42 = vmul.f32 -1.442695, %v1124_v3 }
 0xe89   :  { %3509 = vtanh.f32 %v1123_v41  ;;  %v2971_v9 = vmul.f32 -1.442695, %v1123_v41 }
 0xe8a   :  { %3511 = vpow2.f32 %v2972_v42 }
 0xe8b   :  { %3513 = vpow2.f32 %v2971_v9 }
 0xe94   :  { %v3508_v5 = vpop.eup %3507 }
 0xe95   :  { %1145 = vrot.lane.b32.xlu1 %v3508_v5, %s3777_s16 }
 0xe96   :  { %v3510_v8 = vpop.eup %3509 }
 0xe97   :  { %1143 = vrot.lane.b32.xlu0 %v3510_v8, %s3777_s16  ;;  %v3512_v43 = vpop.eup %3511 }
 0xe98   :  { %v3514_v44 = vpop.eup %3513  ;;  %v1132_v45 = vadd.f32 1.0, %v3512_v43 }
 0xe99   :  { %v1131_v46 = vadd.f32 1.0, %v3514_v44 }
 0xe9a   :  { %3515 = vrcp.f32 %v1132_v45 }
 0xe9b   :  { %3517 = vrcp.f32 %v1131_v46 }
 0xea7   :  { %v3516_v47 = vpop.eup %3515 }
 0xea8   :  { %v3518_v50 = vpop.eup %3517  ;;  %v1140_v53 = vmul.f32 %v3516_v47, %v1017_v25  ;;  %v1478_v25 = vld [vmem:[#allocation3 + $0x40] sm:$0xff] }
 0xea9   :  { %v1139_v56 = vmul.f32 %v3518_v50, %v1016_v28 }
 0xf07   :  { %v1146_v48 = vpop.permute.xlu1 %1145 }
 0xf08   :  { %v1150_v49 = vmul.f32 %v3516_v47, %v1146_v48 }
 0xf09   :  { %v1144_v51 = vpop.permute.xlu0 %1143 }
 0xf0a   :  { %1155 = vrot.lane.b32.xlu1 %v1150_v49, %s3778_s17  ;;  %v1149_v52 = vmul.f32 %v3518_v50, %v1144_v51  ;;  %v4134_v51 = vld [vmem:[#allocation10 + $0x10] sm:$0xff] }
 0xf0c   :  { %1153 = vrot.lane.b32.xlu0 %v1149_v52, %s3778_s17  ;;  %v4137_v52 = vld [vmem:[#allocation10 + $0x8] sm:$0xff] }
 0xf7c   :  { %v1156_v54 = vpop.permute.xlu1 %1155 }
 0xf7d   :  { %v4085_v55 = vadd.f32 %v1156_v54, %v1140_v53  ;;  %v4141_v53 = vld [vmem:[#allocation10] sm:$0xff] }
 0xf7e   :  { %v1154_v61 = vpop.permute.xlu0 %1153 }
 0xf7f   :  { %3519 = vtanh.f32 %v4085_v55  ;;  %v4088_v62 = vadd.f32 %v1154_v61, %v1139_v56 }
 0xf81   :  { %3521 = vtanh.f32 %v4088_v62 }
 0xf8c   :  { %v3520_v63 = vpop.eup %3519 }
 0xf8d   :  { %1167 = vrot.lane.b32.xlu1 %v3520_v63, %s3777_s16 }
 0xf8e   :  { %v3522_v0 = vpop.eup %3521 }
 0xf8f   :  { %1165 = vrot.lane.b32.xlu0 %v3522_v0, %s3777_s16 }
 0xfff   :  { %v1168_v4 = vpop.permute.xlu1 %1167 }
0x1000   :  { %v1172_v6 = vmul.f32 %v3516_v47, %v1168_v4 }
0x1001   :  { %v1166_v7 = vpop.permute.xlu0 %1165 }
0x1002   :  { %1177 = vrot.lane.b32.xlu1 %v1172_v6, %s3778_s17  ;;  %v1171_v10 = vmul.f32 %v3518_v50, %v1166_v7  ;;  %v4129_v50 = vld [vmem:[#allocation10 + $0x18] sm:$0xff] }
0x1003   :  { %3319 = vmatprep.subr.mxu1 %v4129_v50 }
0x1004   :  { %1175 = vrot.lane.b32.xlu0 %v1171_v10, %s3778_s17 }
0x1074   :  { %v1178_v12 = vpop.permute.xlu1 %1177 }
0x1075   :  { %1183 = vst.msk [vmem:[#allocation3 + $0x58] sm:$0xff] %vm330_vm1, %v1178_v12 }
0x1076   :  { %v1176_v13 = vpop.permute.xlu0 %1175 }
0x1077   :  { %1182 = vst.msk [vmem:[#allocation3 + $0x50] sm:$0xff] %vm330_vm1, %v1176_v13  ;;  %3273 = vmatprep.mubr.msk.f32.mxu0 %vm330_vm1, %v1176_v13 }
0x1078   :  { %3274 = vmatmul.mubr.msk.f32.vlgmr.msra.gmra.mxu0 %vm330_vm1, %v1178_v12  ;;  %v4185_v12 = vld [vmem:[%s4416_s6] ss:$0 sm:$0xff] }
0x1079   :  { %3288 = vmatpush3.msra.mxu0 %v1489_v2  ;;  %3295 = vmatprep.mubr.msk.f32.mxu0 %vm330_vm1, %v1470_v15 }
0x107a   :  { %3289 = vmatprep.subr.mxu0 %v1488_v14 }
0x107b   :  { %3290 = vmatpush3.msra.mxu0 %v1488_v14 }
0x107c   :  { %3291 = vmatprep.subr.mxu0 %v1487_v16  ;;  %v1481_v28 = vld [vmem:[#allocation3 + $0x58] sm:$0xff] }
0x107d   :  { %3292 = vmatpush3.msra.mxu0 %v1487_v16 }
0x107e   :  { %3293 = vmatprep.subr.mxu0 %v1486_v17  ;;  %v1480_v27 = vld [vmem:[#allocation3 + $0x50] sm:$0xff] }
0x107f   :  { %3294 = vmatpush3.msra.mxu0 %v1486_v17 }
0x1080   :  { %3296 = vmatmul.mubr.msk.f32.vlgmr.msra.gmra.mxu0 %vm330_vm1, %v1471_v18  ;;  %3363 = vmatprep.subr.mxu0 %v4129_v50 }
0x1081   :  { %3298 = vmatprep.mubr.msk.f32.mxu0 %vm330_vm1, %v1472_v19  ;;  %3364 = vmatpush3.msra.mxu0 %v4129_v50 }
0x1082   :  { %3365 = vmatprep.subr.mxu0 %v4134_v51 }
0x1083   :  { %3366 = vmatpush3.msra.mxu0 %v4134_v51 }
0x1084   :  { %3299 = vmatmul.mubr.msk.f32.gmra.mxu0 %vm330_vm1, %v1473_v20  ;;  %3367 = vmatprep.subr.mxu0 %v4137_v52 }
0x1085   :  { %3301 = vmatprep.mubr.msk.f32.mxu0 %vm330_vm1, %v1474_v21  ;;  %3368 = vmatpush3.msra.mxu0 %v4137_v52 }
0x1086   :  { %3369 = vmatprep.subr.mxu0 %v4141_v53 }
0x1087   :  { %3370 = vmatpush3.msra.mxu0 %v4141_v53 }
0x1088   :  { %3302 = vmatmul.mubr.msk.f32.gmra.mxu0 %vm330_vm1, %v1475_v22  ;;  %3385 = vmatprep.subr.mxu0 %v4129_v50 }
0x1089   :  { %3304 = vmatprep.mubr.msk.f32.mxu0 %vm330_vm1, %v1476_v23 }
0x108c   :  { %3305 = vmatmul.mubr.msk.f32.gmra.mxu0 %vm330_vm1, %v1477_v24 }
0x108d   :  { %3307 = vmatprep.mubr.msk.f32.mxu0 %vm330_vm1, %v1478_v25 }
0x1090   :  { %3308 = vmatmul.mubr.msk.f32.gmra.mxu0 %vm330_vm1, %v1479_v26 }
0x1091   :  { %3310 = vmatprep.mubr.msk.f32.mxu0 %vm330_vm1, %v1480_v27 }
0x1094   :  { %3311 = vmatmul.mubr.msk.f32.gmra.mxu0 %vm330_vm1, %v1481_v28 }
0x1138   :  { %v3275_v30 = vpop.f32.mrf.mxu0 }
0x1139   :  { %v1267_v32 = vadd.f32 %v3275_v30, %v295_v29 }
0x113a   :  { %v1257_v34 = vpop.f32.mrf.mxu0 }
0x113b   :  { %3523 = vtanh.f32 %v1267_v32  ;;  %v1266_v33 = vadd.f32 %v1257_v34, %v290_v31  ;;  %v2976_v37 = vmul.f32 -1.442695, %v1267_v32 }
0x113d   :  { %3525 = vtanh.f32 %v1266_v33  ;;  %v2975_v38 = vmul.f32 -1.442695, %v1266_v33 }
0x113e   :  { %3527 = vpow2.f32 %v2976_v37 }
0x113f   :  { %3529 = vpow2.f32 %v2975_v38 }
0x1140   :  { %v3297_v10 = vpop.f32.mrf.mxu0 }
0x1141   :  { %v1617_v15 = vadd.f32 %v3297_v10, %v4185_v12 }
0x1142   :  { %v1611_v13 = vpop.f32.mrf.mxu0 }
0x1143   :  { %v1612_v17 = vadd.f32 %v4185_v12, %v1611_v13 }
0x1148   :  { %v3524_v35 = vpop.eup %3523 }
0x1149   :  { %1288 = vrot.lane.b32.xlu1 %v3524_v35, %s3777_s16 }
0x114a   :  { %v3526_v36 = vpop.eup %3525 }
0x114b   :  { %1286 = vrot.lane.b32.xlu0 %v3526_v36, %s3777_s16  ;;  %v3528_v57 = vpop.eup %3527 }
0x114c   :  { %v3530_v39 = vpop.eup %3529  ;;  %v1275_v3 = vadd.f32 1.0, %v3528_v57 }
0x114d   :  { %v1274_v40 = vadd.f32 1.0, %v3530_v39 }
0x114e   :  { %3531 = vrcp.f32 %v1275_v3 }
0x114f   :  { %3533 = vrcp.f32 %v1274_v40 }
0x115b   :  { %v3532_v11 = vpop.eup %3531 }
0x115c   :  { %v3534_v5 = vpop.eup %3533  ;;  %v1283_v9 = vmul.f32 %v3532_v11, %v4085_v55 }
0x115d   :  { %v1282_v45 = vmul.f32 %v3534_v5, %v4088_v62 }
0x11bb   :  { %v1289_v58 = vpop.permute.xlu1 %1288 }
0x11bc   :  { %v1293_v41 = vmul.f32 %v3532_v11, %v1289_v58 }
0x11bd   :  { %v1287_v8 = vpop.permute.xlu0 %1286 }
0x11be   :  { %1298 = vrot.lane.b32.xlu1 %v1293_v41, %s3778_s17  ;;  %v1292_v42 = vmul.f32 %v3534_v5, %v1287_v8 }
0x11c0   :  { %1296 = vrot.lane.b32.xlu0 %v1292_v42, %s3778_s17  ;;  %v3300_v42 = vpop.f32.mrf.mxu0 }
0x1230   :  { %v1299_v43 = vpop.permute.xlu1 %1298 }
0x1231   :  { %v4120_v44 = vadd.f32 %v1299_v43, %v1283_v9  ;;  %v1621_v9 = vpop.f32.mrf.mxu0  ;;  %v1627_v43 = vadd.f32 %v3300_v42, %v4185_v12 }
0x1232   :  { %v1297_v46 = vpop.permute.xlu0 %1296 }
0x1233   :  { %3535 = vtanh.f32 %v4120_v44  ;;  %v4124_v47 = vadd.f32 %v1297_v46, %v1282_v45  ;;  %v1622_v46 = vadd.f32 %v4185_v12, %v1621_v9 }
0x1235   :  { %3537 = vtanh.f32 %v4124_v47 }
0x1240   :  { %v3536_v48 = vpop.eup %3535 }
0x1241   :  { %1310 = vrot.lane.b32.xlu1 %v3536_v48, %s3777_s16 }
0x1242   :  { %v3538_v49 = vpop.eup %3537 }
0x1243   :  { %1308 = vrot.lane.b32.xlu0 %v3538_v49, %s3777_s16 }
0x12b3   :  { %v1311_v54 = vpop.permute.xlu1 %1310 }
0x12b4   :  { %v1315_v55 = vmul.f32 %v3532_v11, %v1311_v54 }
0x12b5   :  { %v1309_v56 = vpop.permute.xlu0 %1308 }
0x12b6   :  { %1320 = vrot.lane.b32.xlu1 %v1315_v55, %s3778_s17  ;;  %v1314_v61 = vmul.f32 %v3534_v5, %v1309_v56 }
0x12b8   :  { %1318 = vrot.lane.b32.xlu0 %v1314_v61, %s3778_s17 }
0x1328   :  { %v1321_v62 = vpop.permute.xlu1 %1320 }
0x1329   :  { %1326 = vst.msk [vmem:[#allocation3 + $0x68] sm:$0xff] %vm330_vm1, %v1321_v62 }
0x132a   :  { %v1319_v63 = vpop.permute.xlu0 %1318 }
0x132b   :  { %1325 = vst.msk [vmem:[#allocation3 + $0x60] sm:$0xff] %vm330_vm1, %v1319_v63  ;;  %3284 = vmatprep.mubr.msk.f32.mxu1 %vm330_vm1, %v1319_v63 }
0x132c   :  { %3285 = vmatmul.mubr.msk.f32.vlgmr.msra.gmra.mxu1 %vm330_vm1, %v1321_v62 }
0x132d   :  { %3320 = vmatpush3.msra.mxu1 %v4129_v50  ;;  %3327 = vmatprep.mubr.f32.mxu1 %v3776_v1 }
0x132e   :  { %3321 = vmatprep.subr.mxu1 %v4134_v51 }
0x132f   :  { %3322 = vmatpush3.msra.mxu1 %v4134_v51 }
0x1330   :  { %3323 = vmatprep.subr.mxu1 %v4137_v52  ;;  %v1483_v2 = vld [vmem:[#allocation3 + $0x68] sm:$0xff] }
0x1331   :  { %3324 = vmatpush3.msra.mxu1 %v4137_v52 }
0x1332   :  { %3325 = vmatprep.subr.mxu1 %v4141_v53  ;;  %v1482_v0 = vld [vmem:[#allocation3 + $0x60] sm:$0xff] }
0x1333   :  { %3326 = vmatpush3.msra.mxu1 %v4141_v53  ;;  %3313 = vmatprep.mubr.msk.f32.mxu0 %vm330_vm1, %v1482_v0 }
0x1334   :  { %3328 = vmatmul.mubr.f32.vlgmr.msra.gmra.mxu1 %v3776_v1  ;;  %3314 = vmatmul.mubr.msk.f32.gmra.mxu0 %vm330_vm1, %v1483_v2  ;;  %v4176_v1 = vld [vmem:[%s4413_s3] ss:$0 sm:$0xff] }
0x1335   :  { %3330 = vmatprep.subr.mxu1 %v4129_v50  ;;  %v305_v4 = vadd.f32 %v4176_v1, %v4050_v59 }
0x1336   :  { %3331 = vmatpush3.msra.mxu1 %v4129_v50 }
0x1337   :  { %3332 = vmatprep.subr.mxu1 %v4134_v51 }
0x1338   :  { %3333 = vmatpush3.msra.mxu1 %v4134_v51 }
0x1339   :  { %3334 = vmatprep.subr.mxu1 %v4137_v52 }
0x133a   :  { %3335 = vmatpush3.msra.mxu1 %v4137_v52 }
0x133b   :  { %3336 = vmatprep.subr.mxu1 %v4141_v53 }
0x133c   :  { %3337 = vmatpush3.msra.mxu1 %v4141_v53 }
0x133d   :  { %3341 = vmatprep.subr.mxu1 %v4129_v50 }
0x13ec   :  { %v3286_v6 = vpop.f32.mrf.mxu1 }
0x13ed   :  { %v4180_v7 = vadd.f32 %v3286_v6, %v305_v4 }
0x13ee   :  { %v4187_v14 = vpop.f32.mrf.mxu1 }
0x13f4   :  { %v3329_v16 = vpop.f32.mrf.mxu1 }
0x13f5   :  { %v1788_v18 = vadd.f32 %v3329_v16, %v1617_v15 }
0x13f6   :  { %v1778_v19 = vpop.f32.mrf.mxu1 }
0x13f7   :  { %3539 = vtanh.f32 %v1788_v18  ;;  %v1787_v59 = vadd.f32 %v1778_v19, %v1612_v17  ;;  %v2999_v22 = vmul.f32 -1.442695, %v1788_v18 }
0x13f9   :  { %3541 = vtanh.f32 %v1787_v59  ;;  %v2998_v23 = vmul.f32 -1.442695, %v1787_v59 }
0x13fa   :  { %3543 = vpow2.f32 %v2999_v22 }
0x13fb   :  { %3545 = vpow2.f32 %v2998_v23 }
0x1404   :  { %v3540_v20 = vpop.eup %3539 }
0x1405   :  { %1809 = vrot.lane.b32.xlu1 %v3540_v20, %s3777_s16 }
0x1406   :  { %v3542_v21 = vpop.eup %3541 }
0x1407   :  { %1807 = vrot.lane.b32.xlu0 %v3542_v21, %s3777_s16  ;;  %v3544_v24 = vpop.eup %3543 }
0x1408   :  { %v3546_v25 = vpop.eup %3545  ;;  %v1796_v26 = vadd.f32 1.0, %v3544_v24 }
0x1409   :  { %v1795_v27 = vadd.f32 1.0, %v3546_v25 }
0x140a   :  { %3547 = vrcp.f32 %v1796_v26 }
0x140b   :  { %3549 = vrcp.f32 %v1795_v27 }
0x1417   :  { %v3548_v28 = vpop.eup %3547 }
0x1418   :  { %v3550_v31 = vpop.eup %3549  ;;  %v1804_v33 = vmul.f32 0.0, %v3548_v28 }
0x1419   :  { %v1803_v37 = vmul.f32 0.0, %v3550_v31 }
0x1477   :  { %v1810_v29 = vpop.permute.xlu1 %1809 }
0x1478   :  { %v1814_v30 = vmul.f32 %v3548_v28, %v1810_v29 }
0x1479   :  { %v1808_v32 = vpop.permute.xlu0 %1807 }
0x147a   :  { %1819 = vrot.lane.b32.xlu1 %v1814_v30, %s3778_s17  ;;  %v1813_v34 = vmul.f32 %v3550_v31, %v1808_v32 }
0x147c   :  { %1817 = vrot.lane.b32.xlu0 %v1813_v34, %s3778_s17 }
0x14ec   :  { %v1820_v35 = vpop.permute.xlu1 %1819 }
0x14ed   :  { %v1824_v36 = vadd.f32 %v1820_v35, %v1804_v33 }
0x14ee   :  { %v1818_v38 = vpop.permute.xlu0 %1817 }
0x14ef   :  { %3551 = vtanh.f32 %v1824_v36  ;;  %v1823_v57 = vadd.f32 %v1818_v38, %v1803_v37 }
0x14f1   :  { %3553 = vtanh.f32 %v1823_v57 }
0x14fc   :  { %v3552_v39 = vpop.eup %3551 }
0x14fd   :  { %1831 = vrot.lane.b32.xlu1 %v3552_v39, %s3777_s16 }
0x14fe   :  { %v3554_v3 = vpop.eup %3553 }
0x14ff   :  { %1829 = vrot.lane.b32.xlu0 %v3554_v3, %s3777_s16 }
0x156f   :  { %v1832_v40 = vpop.permute.xlu1 %1831 }
0x1570   :  { %v1836_v11 = vmul.f32 %v3548_v28, %v1832_v40 }
0x1571   :  { %v1830_v58 = vpop.permute.xlu0 %1829 }
0x1572   :  { %1841 = vrot.lane.b32.xlu1 %v1836_v11, %s3778_s17  ;;  %v1835_v41 = vmul.f32 %v3550_v31, %v1830_v58  ;;  %v3303_v31 = vpop.f32.mrf.mxu0 }
0x1573   :  { %v1637_v34 = vadd.f32 %v3303_v31, %v4185_v12 }
0x1574   :  { %1839 = vrot.lane.b32.xlu0 %v1835_v41, %s3778_s17  ;;  %v1631_v32 = vpop.f32.mrf.mxu0 }
0x1575   :  { %v1632_v35 = vadd.f32 %v4185_v12, %v1631_v32 }
0x15e4   :  { %v1842_v5 = vpop.permute.xlu1 %1841 }
0x15e5   :  { %1846 = vst.msk [vmem:[#allocation3 + $0x8] sm:$0xff] %vm330_vm1, %v1842_v5 }
0x15e6   :  { %v1840_v8 = vpop.permute.xlu0 %1839 }
0x15e7   :  { %1845 = vst.msk [vmem:[#allocation3] sm:$0xff] %vm330_vm1, %v1840_v8  ;;  %3338 = vmatprep.mubr.msk.f32.mxu1 %vm330_vm1, %v1840_v8 }
0x15e8   :  { %3339 = vmatmul.mubr.msk.f32.vlgmr.msra.gmra.mxu1 %vm330_vm1, %v1842_v5 }
0x15e9   :  { %3342 = vmatpush3.msra.mxu1 %v4129_v50 }
0x15ea   :  { %3343 = vmatprep.subr.mxu1 %v4134_v51 }
0x15eb   :  { %3344 = vmatpush3.msra.mxu1 %v4134_v51 }
0x15ec   :  { %3345 = vmatprep.subr.mxu1 %v4137_v52 }
0x15ed   :  { %3346 = vmatpush3.msra.mxu1 %v4137_v52 }
0x15ee   :  { %3347 = vmatprep.subr.mxu1 %v4141_v53 }
0x15ef   :  { %3348 = vmatpush3.msra.mxu1 %v4141_v53 }
0x15f0   :  { %3352 = vmatprep.subr.mxu1 %v4129_v50 }
0x16a8   :  { %v3340_v45 = vpop.f32.mrf.mxu1 }
0x16a9   :  { %v1929_v48 = vadd.f32 %v3340_v45, %v1627_v43 }
0x16aa   :  { %v1919_v49 = vpop.f32.mrf.mxu1 }
0x16ab   :  { %3555 = vtanh.f32 %v1929_v48  ;;  %v1928_v54 = vadd.f32 %v1919_v49, %v1622_v46  ;;  %v3003_v61 = vmul.f32 -1.442695, %v1929_v48 }
0x16ad   :  { %3557 = vtanh.f32 %v1928_v54  ;;  %v3002_v62 = vmul.f32 -1.442695, %v1928_v54 }
0x16ae   :  { %3559 = vpow2.f32 %v3003_v61 }
0x16af   :  { %3561 = vpow2.f32 %v3002_v62 }
0x16b8   :  { %v3556_v55 = vpop.eup %3555 }
0x16b9   :  { %1950 = vrot.lane.b32.xlu1 %v3556_v55, %s3777_s16 }
0x16ba   :  { %v3558_v56 = vpop.eup %3557 }
0x16bb   :  { %1948 = vrot.lane.b32.xlu0 %v3558_v56, %s3777_s16  ;;  %v3560_v63 = vpop.eup %3559 }
0x16bc   :  { %v3562_v0 = vpop.eup %3561  ;;  %v1937_v2 = vadd.f32 1.0, %v3560_v63 }
0x16bd   :  { %v1936_v4 = vadd.f32 1.0, %v3562_v0  ;;  %v300_v0 = vadd.f32 %v4176_v1, %v4052_v60 }
0x16be   :  { %3563 = vrcp.f32 %v1937_v2 }
0x16bf   :  { %3565 = vrcp.f32 %v1936_v4  ;;  %v1409_v2 = vadd.f32 %v4187_v14, %v300_v0  ;;  %v2980_v14 = vmul.f32 -1.442695, %v4180_v7 }
0x16cb   :  { %v3564_v6 = vpop.eup %3563 }
0x16cc   :  { %v3566_v15 = vpop.eup %3565  ;;  %v1945_v18 = vmul.f32 %v3564_v6, %v1824_v36 }
0x16cd   :  { %v1944_v20 = vmul.f32 %v3566_v15, %v1823_v57 }
0x172b   :  { %v1951_v10 = vpop.permute.xlu1 %1950 }
0x172c   :  { %v1955_v13 = vmul.f32 %v3564_v6, %v1951_v10 }
0x172d   :  { %v1949_v16 = vpop.permute.xlu0 %1948 }
0x172e   :  { %1960 = vrot.lane.b32.xlu1 %v1955_v13, %s3778_s17  ;;  %v1954_v17 = vmul.f32 %v3566_v15, %v1949_v16 }
0x1730   :  { %1958 = vrot.lane.b32.xlu0 %v1954_v17, %s3778_s17  ;;  %v2979_v17 = vmul.f32 -1.442695, %v1409_v2 }
0x17a0   :  { %v1961_v19 = vpop.permute.xlu1 %1960 }
0x17a1   :  { %v1965_v59 = vadd.f32 %v1961_v19, %v1945_v18  ;;  %v3306_v18 = vpop.f32.mrf.mxu0 }
0x17a2   :  { %v1959_v21 = vpop.permute.xlu0 %1958 }
0x17a3   :  { %3567 = vtanh.f32 %v1965_v59  ;;  %v1964_v22 = vadd.f32 %v1959_v21, %v1944_v20  ;;  %v1647_v20 = vadd.f32 %v3306_v18, %v4185_v12 }
0x17a5   :  { %3569 = vtanh.f32 %v1964_v22 }
0x17b0   :  { %v3568_v23 = vpop.eup %3567 }
0x17b1   :  { %1972 = vrot.lane.b32.xlu1 %v3568_v23, %s3777_s16 }
0x17b2   :  { %v3570_v24 = vpop.eup %3569 }
0x17b3   :  { %1970 = vrot.lane.b32.xlu0 %v3570_v24, %s3777_s16 }
0x1823   :  { %v1973_v25 = vpop.permute.xlu1 %1972 }
0x1824   :  { %v1977_v26 = vmul.f32 %v3564_v6, %v1973_v25 }
0x1825   :  { %v1971_v27 = vpop.permute.xlu0 %1970 }
0x1826   :  { %1982 = vrot.lane.b32.xlu1 %v1977_v26, %s3778_s17  ;;  %v1976_v28 = vmul.f32 %v3566_v15, %v1971_v27 }
0x1828   :  { %1980 = vrot.lane.b32.xlu0 %v1976_v28, %s3778_s17 }
0x1898   :  { %v1983_v29 = vpop.permute.xlu1 %1982 }
0x1899   :  { %1987 = vst.msk [vmem:[#allocation3 + $0x18] sm:$0xff] %vm330_vm1, %v1983_v29 }
0x189a   :  { %v1981_v30 = vpop.permute.xlu0 %1980 }
0x189b   :  { %1986 = vst.msk [vmem:[#allocation3 + $0x10] sm:$0xff] %vm330_vm1, %v1981_v30  ;;  %3349 = vmatprep.mubr.msk.f32.mxu1 %vm330_vm1, %v1981_v30 }
0x189c   :  { %3350 = vmatmul.mubr.msk.f32.vlgmr.msra.gmra.mxu1 %vm330_vm1, %v1983_v29 }
0x189d   :  { %3353 = vmatpush3.msra.mxu1 %v4129_v50 }
0x189e   :  { %3354 = vmatprep.subr.mxu1 %v4134_v51 }
0x189f   :  { %3355 = vmatpush3.msra.mxu1 %v4134_v51 }
0x18a0   :  { %3356 = vmatprep.subr.mxu1 %v4137_v52 }
0x18a1   :  { %3357 = vmatpush3.msra.mxu1 %v4137_v52 }
0x18a2   :  { %3358 = vmatprep.subr.mxu1 %v4141_v53 }
0x18a3   :  { %3359 = vmatpush3.msra.mxu1 %v4141_v53 }
0x18a4   :  { %3374 = vmatprep.subr.mxu1 %v4129_v50 }
0x195c   :  { %v3351_v33 = vpop.f32.mrf.mxu1 }
0x195d   :  { %v2070_v36 = vadd.f32 %v3351_v33, %v1637_v34 }
0x195e   :  { %v2060_v37 = vpop.f32.mrf.mxu1 }
0x195f   :  { %3571 = vtanh.f32 %v2070_v36  ;;  %v2069_v38 = vadd.f32 %v2060_v37, %v1632_v35  ;;  %v3007_v3 = vmul.f32 -1.442695, %v2070_v36 }
0x1961   :  { %3573 = vtanh.f32 %v2069_v38  ;;  %v3006_v40 = vmul.f32 -1.442695, %v2069_v38 }
0x1962   :  { %3575 = vpow2.f32 %v3007_v3 }
0x1963   :  { %3577 = vpow2.f32 %v3006_v40 }
0x196c   :  { %v3572_v57 = vpop.eup %3571 }
0x196d   :  { %2091 = vrot.lane.b32.xlu1 %v3572_v57, %s3777_s16 }
0x196e   :  { %v3574_v39 = vpop.eup %3573 }
0x196f   :  { %2089 = vrot.lane.b32.xlu0 %v3574_v39, %s3777_s16  ;;  %v3576_v11 = vpop.eup %3575 }
0x1970   :  { %v3578_v58 = vpop.eup %3577  ;;  %v2078_v41 = vadd.f32 1.0, %v3576_v11 }
0x1971   :  { %v2077_v5 = vadd.f32 1.0, %v3578_v58 }
0x1972   :  { %3579 = vrcp.f32 %v2078_v41 }
0x1973   :  { %3581 = vrcp.f32 %v2077_v5 }
0x197f   :  { %v3580_v8 = vpop.eup %3579 }
0x1980   :  { %v3582_v43 = vpop.eup %3581  ;;  %v2086_v48 = vmul.f32 %v3580_v8, %v1965_v59  ;;  %v1641_v59 = vpop.f32.mrf.mxu0 }
0x1981   :  { %v2085_v55 = vmul.f32 %v3582_v43, %v1964_v22  ;;  %v1642_v23 = vadd.f32 %v4185_v12, %v1641_v59 }
0x19df   :  { %v2092_v42 = vpop.permute.xlu1 %2091 }
0x19e0   :  { %v2096_v9 = vmul.f32 %v3580_v8, %v2092_v42 }
0x19e1   :  { %v2090_v45 = vpop.permute.xlu0 %2089 }
0x19e2   :  { %2101 = vrot.lane.b32.xlu1 %v2096_v9, %s3778_s17  ;;  %v2095_v46 = vmul.f32 %v3582_v43, %v2090_v45 }
0x19e4   :  { %2099 = vrot.lane.b32.xlu0 %v2095_v46, %s3778_s17 }
0x1a54   :  { %v2102_v49 = vpop.permute.xlu1 %2101 }
0x1a55   :  { %v4239_v54 = vadd.f32 %v2102_v49, %v2086_v48 }
0x1a56   :  { %v2100_v56 = vpop.permute.xlu0 %2099 }
0x1a57   :  { %3583 = vtanh.f32 %v4239_v54  ;;  %v4242_v61 = vadd.f32 %v2100_v56, %v2085_v55 }
0x1a59   :  { %3585 = vtanh.f32 %v4242_v61 }
0x1a5a   :  { %3587 = vtanh.f32 %v4180_v7 }
0x1a5b   :  { %3589 = vtanh.f32 %v1409_v2 }
0x1a5c   :  { %3591 = vpow2.f32 %v2980_v14 }
0x1a5d   :  { %3593 = vpow2.f32 %v2979_v17 }
0x1a64   :  { %v3584_v62 = vpop.eup %3583 }
0x1a65   :  { %2113 = vrot.lane.b32.xlu1 %v3584_v62, %s3777_s16 }
0x1a66   :  { %v3586_v63 = vpop.eup %3585 }
0x1a67   :  { %2111 = vrot.lane.b32.xlu0 %v3586_v63, %s3777_s16  ;;  %v3588_v15 = vpop.eup %3587 }
0x1a68   :  { %v3590_v16 = vpop.eup %3589 }
0x1a69   :  { %v3592_v19 = vpop.eup %3591 }
0x1a6a   :  { %v3594_v22 = vpop.eup %3593  ;;  %v1418_v24 = vadd.f32 1.0, %v3592_v19 }
0x1a6b   :  { %v1417_v28 = vadd.f32 1.0, %v3594_v22 }
0x1ad7   :  { %v2114_v4 = vpop.permute.xlu1 %2113 }
0x1ad8   :  { %v2118_v6 = vmul.f32 %v3580_v8, %v2114_v4 }
0x1ad9   :  { %v2112_v10 = vpop.permute.xlu0 %2111 }
0x1ada   :  { %2123 = vrot.lane.b32.xlu1 %v2118_v6, %s3778_s17  ;;  %v2117_v13 = vmul.f32 %v3582_v43, %v2112_v10 }
0x1adc   :  { %2121 = vrot.lane.b32.xlu0 %v2117_v13, %s3778_s17 }
0x1ade   :  { %1431 = vrot.lane.b32.xlu1 %v3588_v15, %s3777_s16 }
0x1ae0   :  { %1429 = vrot.lane.b32.xlu0 %v3590_v16, %s3777_s16 }
0x1b4c   :  { %v2124_v60 = vpop.permute.xlu1 %2123 }
0x1b4d   :  { %2128 = vst.msk [vmem:[#allocation3 + $0x28] sm:$0xff] %vm330_vm1, %v2124_v60 }
0x1b4e   :  { %v2122_v1 = vpop.permute.xlu0 %2121 }
0x1b4f   :  { %2127 = vst.msk [vmem:[#allocation3 + $0x20] sm:$0xff] %vm330_vm1, %v2122_v1  ;;  %3360 = vmatprep.mubr.msk.f32.mxu1 %vm330_vm1, %v2122_v1 }
0x1b50   :  { %3361 = vmatmul.mubr.msk.f32.vlgmr.msra.gmra.mxu1 %vm330_vm1, %v2124_v60  ;;  %v1432_v29 = vpop.permute.xlu1 %1431 }
0x1b51   :  { %3375 = vmatpush3.msra.mxu1 %v4129_v50 }
0x1b52   :  { %3376 = vmatprep.subr.mxu1 %v4134_v51  ;;  %v1430_v34 = vpop.permute.xlu0 %1429 }
0x1b53   :  { %3377 = vmatpush3.msra.mxu1 %v4134_v51 }
0x1b54   :  { %3378 = vmatprep.subr.mxu1 %v4137_v52 }
0x1b55   :  { %3379 = vmatpush3.msra.mxu1 %v4137_v52 }
0x1b56   :  { %3380 = vmatprep.subr.mxu1 %v4141_v53 }
0x1b57   :  { %3381 = vmatpush3.msra.mxu1 %v4141_v53 }
0x1b58   :  { %3396 = vmatprep.subr.mxu1 %v4129_v50 }
0x1c10   :  { %v3362_v21 = vpop.f32.mrf.mxu1 }
0x1c11   :  { %v2211_v25 = vadd.f32 %v3362_v21, %v1647_v20  ;;  %v3309_v20 = vpop.f32.mrf.mxu0 }
0x1c12   :  { %v2201_v26 = vpop.f32.mrf.mxu1 }
0x1c13   :  { %3595 = vtanh.f32 %v2211_v25  ;;  %v2210_v27 = vadd.f32 %v2201_v26, %v1642_v23  ;;  %v3011_v36 = vmul.f32 -1.442695, %v2211_v25  ;;  %v1651_v21 = vpop.f32.mrf.mxu0 }
0x1c14   :  { %3597 = vrcp.f32 %v1418_v24 }
0x1c15   :  { %3599 = vtanh.f32 %v2210_v27  ;;  %v3010_v37 = vmul.f32 -1.442695, %v2210_v27  ;;  %v4309_v22 = vpop.f32.mrf.mxu0 }
0x1c16   :  { %3601 = vrcp.f32 %v1417_v28  ;;  %v1657_v28 = vadd.f32 %v3309_v20, %v4185_v12 }
0x1c17   :  { %3603 = vpow2.f32 %v3011_v36  ;;  %v4311_v23 = vpop.f32.mrf.mxu0 }
0x1c18   :  { %3605 = vpow2.f32 %v3010_v37 }
0x1c19   :  { %v4313_v24 = vpop.f32.mrf.mxu0 }
0x1c1b   :  { %v4315_v25 = vpop.f32.mrf.mxu0 }
0x1c20   :  { %v3596_v7 = vpop.eup %3595 }
0x1c21   :  { %2232 = vrot.lane.b32.xlu1 %v3596_v7, %s3777_s16  ;;  %v3598_v30 = vpop.eup %3597 }
0x1c22   :  { %v3600_v31 = vpop.eup %3599  ;;  %v1436_v32 = vmul.f32 %v3598_v30, %v1432_v29  ;;  %v1426_v8 = vmul.f32 %v3598_v30, %v4120_v44  ;;  %v1652_v29 = vadd.f32 %v4185_v12, %v1651_v21 }
0x1c23   :  { %2230 = vrot.lane.b32.xlu0 %v3600_v31, %s3777_s16  ;;  %v3602_v33 = vpop.eup %3601 }
0x1c24   :  { %v1435_v35 = vmul.f32 %v3602_v33, %v1430_v34  ;;  %v3604_v38 = vpop.eup %3603  ;;  %v1425_v45 = vmul.f32 %v3602_v33, %v4124_v47 }
0x1c25   :  { %1441 = vrot.lane.b32.xlu1 %v1436_v32, %s3778_s17  ;;  %v3606_v57 = vpop.eup %3605  ;;  %v2219_v39 = vadd.f32 1.0, %v3604_v38 }
0x1c26   :  { %v2218_v3 = vadd.f32 1.0, %v3606_v57 }
0x1c27   :  { %1439 = vrot.lane.b32.xlu0 %v1435_v35, %s3778_s17  ;;  %3607 = vrcp.f32 %v2219_v39 }
0x1c28   :  { %3609 = vrcp.f32 %v2218_v3 }
0x1c34   :  { %v3608_v40 = vpop.eup %3607 }
0x1c35   :  { %v3610_v41 = vpop.eup %3609  ;;  %v2227_v56 = vmul.f32 %v3608_v40, %v4239_v54 }
0x1c36   :  { %v2226_v63 = vmul.f32 %v3610_v41, %v4242_v61 }
0x1c93   :  { %v2233_v11 = vpop.permute.xlu1 %2232 }
0x1c94   :  { %v2237_v58 = vmul.f32 %v3608_v40, %v2233_v11 }
0x1c95   :  { %v2231_v5 = vpop.permute.xlu0 %2230 }
0x1c96   :  { %2242 = vrot.lane.b32.xlu1 %v2237_v58, %s3778_s17  ;;  %v2236_v42 = vmul.f32 %v3610_v41, %v2231_v5 }
0x1c97   :  { %v1442_v9 = vpop.permute.xlu1 %1441 }
0x1c98   :  { %v1446_v43 = vadd.f32 %v1442_v9, %v1426_v8  ;;  %2240 = vrot.lane.b32.xlu0 %v2236_v42, %s3778_s17 }
0x1c99   :  { %v1440_v46 = vpop.permute.xlu0 %1439 }
0x1c9a   :  { %3611 = vtanh.f32 %v1446_v43  ;;  %v1445_v48 = vadd.f32 %v1440_v46, %v1425_v45 }
0x1c9c   :  { %3613 = vtanh.f32 %v1445_v48 }
0x1ca7   :  { %v3612_v49 = vpop.eup %3611 }
0x1ca8   :  { %1453 = vrot.lane.b32.xlu1 %v3612_v49, %s3777_s16 }
0x1ca9   :  { %v3614_v55 = vpop.eup %3613 }
0x1caa   :  { %1451 = vrot.lane.b32.xlu0 %v3614_v55, %s3777_s16 }
0x1d08   :  { %v2243_v44 = vpop.permute.xlu1 %2242 }
0x1d09   :  { %v4281_v62 = vadd.f32 %v2243_v44, %v2227_v56 }
0x1d0a   :  { %v2241_v47 = vpop.permute.xlu0 %2240 }
0x1d0b   :  { %3615 = vtanh.f32 %v4281_v62  ;;  %v4285_v0 = vadd.f32 %v2241_v47, %v2226_v63 }
0x1d0d   :  { %3617 = vtanh.f32 %v4285_v0 }
0x1d18   :  { %v3616_v2 = vpop.eup %3615 }
0x1d19   :  { %2254 = vrot.lane.b32.xlu1 %v3616_v2, %s3777_s16 }
0x1d1a   :  { %v1454_v4 = vpop.permute.xlu1 %1453  ;;  %v3618_v6 = vpop.eup %3617 }
0x1d1b   :  { %v1458_v10 = vmul.f32 %v3598_v30, %v1454_v4  ;;  %2252 = vrot.lane.b32.xlu0 %v3618_v6, %s3777_s16  ;;  %v1662_v4 = vadd.f32 %v4185_v12, %v4311_v23 }
0x1d1c   :  { %v1452_v54 = vpop.permute.xlu0 %1451 }
0x1d1d   :  { %1463 = vrot.lane.b32.xlu1 %v1458_v10, %s3778_s17  ;;  %v1457_v13 = vmul.f32 %v3602_v33, %v1452_v54 }
0x1d1f   :  { %1461 = vrot.lane.b32.xlu0 %v1457_v13, %s3778_s17 }
0x1d8b   :  { %v2255_v61 = vpop.permute.xlu1 %2254 }
0x1d8c   :  { %v2259_v15 = vmul.f32 %v3608_v40, %v2255_v61 }
0x1d8d   :  { %v2253_v16 = vpop.permute.xlu0 %2252 }
0x1d8e   :  { %2264 = vrot.lane.b32.xlu1 %v2259_v15, %s3778_s17  ;;  %v2258_v60 = vmul.f32 %v3610_v41, %v2253_v16 }
0x1d8f   :  { %v1464_v1 = vpop.permute.xlu1 %1463 }
0x1d90   :  { %1469 = vst.msk [vmem:[#allocation3 + $0x78] sm:$0xff] %vm330_vm1, %v1464_v1  ;;  %2262 = vrot.lane.b32.xlu0 %v2258_v60, %s3778_s17 }
0x1d91   :  { %v1462_v14 = vpop.permute.xlu0 %1461 }
0x1d92   :  { %1468 = vst.msk [vmem:[#allocation3 + $0x70] sm:$0xff] %vm330_vm1, %v1462_v14 }
0x1d97   :  { %v1485_v18 = vld [vmem:[#allocation3 + $0x78] sm:$0xff] }
0x1d99   :  { %v1484_v17 = vld [vmem:[#allocation3 + $0x70] sm:$0xff] }
0x1d9a   :  { %3316 = vmatprep.mubr.msk.f32.mxu0 %vm330_vm1, %v1484_v17 }
0x1d9b   :  { %3317 = vmatmul.mubr.msk.f32.gmra.mxu0 %vm330_vm1, %v1485_v18 }
0x1e00   :  { %v2265_v19 = vpop.permute.xlu1 %2264 }
0x1e01   :  { %2269 = vst.msk [vmem:[#allocation3 + $0x38] sm:$0xff] %vm330_vm1, %v2265_v19 }
0x1e02   :  { %v2263_v59 = vpop.permute.xlu0 %2262 }
0x1e03   :  { %2268 = vst.msk [vmem:[#allocation3 + $0x30] sm:$0xff] %vm330_vm1, %v2263_v59  ;;  %3371 = vmatprep.mubr.msk.f32.mxu0 %vm330_vm1, %v2263_v59 }
0x1e04   :  { %3372 = vmatmul.mubr.msk.f32.vlgmr.msra.gmra.mxu0 %vm330_vm1, %v2265_v19 }
0x1e05   :  { %3386 = vmatpush3.msra.mxu0 %v4129_v50 }
0x1e06   :  { %3387 = vmatprep.subr.mxu0 %v4134_v51 }
0x1e07   :  { %3388 = vmatpush3.msra.mxu0 %v4134_v51 }
0x1e08   :  { %3389 = vmatprep.subr.mxu0 %v4137_v52 }
0x1e09   :  { %3390 = vmatpush3.msra.mxu0 %v4137_v52 }
0x1e0a   :  { %3391 = vmatprep.subr.mxu0 %v4141_v53 }
0x1e0b   :  { %3392 = vmatpush3.msra.mxu0 %v4141_v53 }
0x1e5b   :  { %v4317_v26 = vpop.f32.mrf.mxu0 }
0x1e5d   :  { %v4319_v27 = vpop.f32.mrf.mxu0 }
0x1ec4   :  { %v3373_v7 = vpop.f32.mrf.mxu0 }
0x1ec5   :  { %v2352_v30 = vadd.f32 %v3373_v7, %v1657_v28 }
0x1ec6   :  { %v2342_v31 = vpop.f32.mrf.mxu0 }
0x1ec7   :  { %3619 = vtanh.f32 %v2352_v30  ;;  %v2351_v32 = vadd.f32 %v2342_v31, %v1652_v29  ;;  %v3015_v35 = vmul.f32 -1.442695, %v2352_v30 }
0x1ec9   :  { %3621 = vtanh.f32 %v2351_v32  ;;  %v3014_v36 = vmul.f32 -1.442695, %v2351_v32 }
0x1eca   :  { %3623 = vpow2.f32 %v3015_v35 }
0x1ecb   :  { %3625 = vpow2.f32 %v3014_v36  ;;  %v1677_v36 = vadd.f32 %v4313_v24, %v4185_v12 }
0x1ed4   :  { %v3620_v34 = vpop.eup %3619 }
0x1ed5   :  { %2373 = vrot.lane.b32.xlu1 %v3620_v34, %s3777_s16 }
0x1ed6   :  { %v3622_v33 = vpop.eup %3621 }
0x1ed7   :  { %2371 = vrot.lane.b32.xlu0 %v3622_v33, %s3777_s16  ;;  %v3624_v37 = vpop.eup %3623 }
0x1ed8   :  { %v3626_v38 = vpop.eup %3625  ;;  %v2360_v57 = vadd.f32 1.0, %v3624_v37 }
0x1ed9   :  { %v2359_v39 = vadd.f32 1.0, %v3626_v38  ;;  %v1672_v38 = vadd.f32 %v4185_v12, %v4315_v25 }
0x1eda   :  { %3627 = vrcp.f32 %v2360_v57 }
0x1edb   :  { %3629 = vrcp.f32 %v2359_v39 }
0x1ee7   :  { %v3628_v3 = vpop.eup %3627 }
0x1ee8   :  { %v3630_v58 = vpop.eup %3629  ;;  %v2368_v8 = vmul.f32 %v3628_v3, %v4281_v62 }
0x1ee9   :  { %v2367_v43 = vmul.f32 %v3630_v58, %v4285_v0  ;;  %v1667_v0 = vadd.f32 %v4309_v22, %v4185_v12 }
0x1f47   :  { %v2374_v40 = vpop.permute.xlu1 %2373 }
0x1f48   :  { %v2378_v11 = vmul.f32 %v3628_v3, %v2374_v40 }
0x1f49   :  { %v2372_v41 = vpop.permute.xlu0 %2371 }
0x1f4a   :  { %2383 = vrot.lane.b32.xlu1 %v2378_v11, %s3778_s17  ;;  %v2377_v5 = vmul.f32 %v3630_v58, %v2372_v41 }
0x1f4c   :  { %2381 = vrot.lane.b32.xlu0 %v2377_v5, %s3778_s17 }
0x1fbc   :  { %v2384_v42 = vpop.permute.xlu1 %2383 }
0x1fbd   :  { %v2388_v9 = vadd.f32 %v2384_v42, %v2368_v8 }
0x1fbe   :  { %v2382_v45 = vpop.permute.xlu0 %2381 }
0x1fbf   :  { %3631 = vtanh.f32 %v2388_v9  ;;  %v2387_v46 = vadd.f32 %v2382_v45, %v2367_v43 }
0x1fc1   :  { %3633 = vtanh.f32 %v2387_v46 }
0x1fcc   :  { %v3632_v48 = vpop.eup %3631 }
0x1fcd   :  { %2395 = vrot.lane.b32.xlu1 %v3632_v48, %s3777_s16 }
0x1fce   :  { %v3634_v49 = vpop.eup %3633 }
0x1fcf   :  { %2393 = vrot.lane.b32.xlu0 %v3634_v49, %s3777_s16 }
0x203f   :  { %v2396_v55 = vpop.permute.xlu1 %2395 }
0x2040   :  { %v2400_v56 = vmul.f32 %v3628_v3, %v2396_v55 }
0x2041   :  { %v2394_v44 = vpop.permute.xlu0 %2393 }
0x2042   :  { %2405 = vrot.lane.b32.xlu1 %v2400_v56, %s3778_s17  ;;  %v2399_v62 = vmul.f32 %v3630_v58, %v2394_v44 }
0x2044   :  { %2403 = vrot.lane.b32.xlu0 %v2399_v62, %s3778_s17 }
0x20b4   :  { %v2406_v63 = vpop.permute.xlu1 %2405 }
0x20b5   :  { %2410 = vst.msk [vmem:[#allocation3 + $0x48] sm:$0xff] %vm330_vm1, %v2406_v63 }
0x20b6   :  { %v2404_v47 = vpop.permute.xlu0 %2403 }
0x20b7   :  { %2409 = vst.msk [vmem:[#allocation3 + $0x40] sm:$0xff] %vm330_vm1, %v2404_v47  ;;  %3382 = vmatprep.mubr.msk.f32.mxu1 %vm330_vm1, %v2404_v47 }
0x20b8   :  { %3383 = vmatmul.mubr.msk.f32.vlgmr.msra.gmra.mxu1 %vm330_vm1, %v2406_v63 }
0x20b9   :  { %3397 = vmatpush3.msra.mxu1 %v4129_v50 }
0x20ba   :  { %3398 = vmatprep.subr.mxu1 %v4134_v51 }
0x20bb   :  { %3399 = vmatpush3.msra.mxu1 %v4134_v51 }
0x20bc   :  { %3400 = vmatprep.subr.mxu1 %v4137_v52 }
0x20bd   :  { %3401 = vmatpush3.msra.mxu1 %v4137_v52 }
0x20be   :  { %3402 = vmatprep.subr.mxu1 %v4141_v53 }
0x20bf   :  { %3403 = vmatpush3.msra.mxu1 %v4141_v53 }
0x2178   :  { %v3384_v2 = vpop.f32.mrf.mxu1 }
0x2179   :  { %v2493_v50 = vadd.f32 %v3384_v2, %v1667_v0 }
0x217a   :  { %v2483_v6 = vpop.f32.mrf.mxu1 }
0x217b   :  { %3635 = vtanh.f32 %v2493_v50  ;;  %v2492_v10 = vadd.f32 %v2483_v6, %v1662_v4  ;;  %v3019_v54 = vmul.f32 -1.442695, %v2493_v50 }
0x217d   :  { %3637 = vtanh.f32 %v2492_v10  ;;  %v3018_v53 = vmul.f32 -1.442695, %v2492_v10 }
0x217e   :  { %3639 = vpow2.f32 %v3019_v54 }
0x217f   :  { %3641 = vpow2.f32 %v3018_v53  ;;  %v1682_v53 = vadd.f32 %v4185_v12, %v4319_v27 }
0x2188   :  { %v3636_v51 = vpop.eup %3635 }
0x2189   :  { %2514 = vrot.lane.b32.xlu1 %v3636_v51, %s3777_s16 }
0x218a   :  { %v3638_v52 = vpop.eup %3637 }
0x218b   :  { %2512 = vrot.lane.b32.xlu0 %v3638_v52, %s3777_s16  ;;  %v3640_v13 = vpop.eup %3639  ;;  %v1687_v52 = vadd.f32 %v4317_v26, %v4185_v12 }
0x218c   :  { %v3642_v61 = vpop.eup %3641  ;;  %v2501_v15 = vadd.f32 1.0, %v3640_v13 }
0x218d   :  { %v2500_v16 = vadd.f32 1.0, %v3642_v61 }
0x218e   :  { %3643 = vrcp.f32 %v2501_v15 }
0x218f   :  { %3645 = vrcp.f32 %v2500_v16 }
0x219b   :  { %v3644_v60 = vpop.eup %3643 }
0x219c   :  { %v3646_v17 = vpop.eup %3645  ;;  %v2509_v59 = vmul.f32 %v3644_v60, %v2388_v9 }
0x219d   :  { %v2508_v22 = vmul.f32 %v3646_v17, %v2387_v46 }
0x21fb   :  { %v2515_v1 = vpop.permute.xlu1 %2514 }
0x21fc   :  { %v2519_v14 = vmul.f32 %v3644_v60, %v2515_v1 }
0x21fd   :  { %v2513_v18 = vpop.permute.xlu0 %2512 }
0x21fe   :  { %2524 = vrot.lane.b32.xlu1 %v2519_v14, %s3778_s17  ;;  %v2518_v19 = vmul.f32 %v3646_v17, %v2513_v18 }
0x2200   :  { %2522 = vrot.lane.b32.xlu0 %v2518_v19, %s3778_s17 }
0x2270   :  { %v2525_v20 = vpop.permute.xlu1 %2524 }
0x2271   :  { %v2529_v21 = vadd.f32 %v2525_v20, %v2509_v59 }
0x2272   :  { %v2523_v23 = vpop.permute.xlu0 %2522 }
0x2273   :  { %3647 = vtanh.f32 %v2529_v21  ;;  %v2528_v28 = vadd.f32 %v2523_v23, %v2508_v22 }
0x2275   :  { %3649 = vtanh.f32 %v2528_v28 }
0x2280   :  { %v3648_v7 = vpop.eup %3647 }
0x2281   :  { %2536 = vrot.lane.b32.xlu1 %v3648_v7, %s3777_s16 }
0x2282   :  { %v3650_v29 = vpop.eup %3649 }
0x2283   :  { %2534 = vrot.lane.b32.xlu0 %v3650_v29, %s3777_s16 }
0x22f3   :  { %v2537_v30 = vpop.permute.xlu1 %2536 }
0x22f4   :  { %v2541_v31 = vmul.f32 %v3644_v60, %v2537_v30 }
0x22f5   :  { %v2535_v32 = vpop.permute.xlu0 %2534 }
0x22f6   :  { %2546 = vrot.lane.b32.xlu1 %v2541_v31, %s3778_s17  ;;  %v2540_v34 = vmul.f32 %v3646_v17, %v2535_v32  ;;  %v2837_v32 = vld [vmem:[%s4417_s7 + $0x18] sm:$0xff] }
0x22f7   :  { %3407 = vmatprep.subr.mxu0 %v2837_v32 }
0x22f8   :  { %2544 = vrot.lane.b32.xlu0 %v2540_v34, %s3778_s17  ;;  %v2836_v34 = vld [vmem:[%s4417_s7 + $0x10] sm:$0xff] }
0x2368   :  { %v2547_v33 = vpop.permute.xlu1 %2546 }
0x2369   :  { %2551 = vst.msk [vmem:[#allocation3 + $0x58] sm:$0xff] %vm330_vm1, %v2547_v33 }
0x236a   :  { %v2545_v35 = vpop.permute.xlu0 %2544 }
0x236b   :  { %2550 = vst.msk [vmem:[#allocation3 + $0x50] sm:$0xff] %vm330_vm1, %v2545_v35  ;;  %3393 = vmatprep.mubr.msk.f32.mxu0 %vm330_vm1, %v2545_v35 }
0x236c   :  { %3394 = vmatmul.mubr.msk.f32.vlgmr.msra.gmra.mxu0 %vm330_vm1, %v2547_v33  ;;  %v2835_v33 = vld [vmem:[%s4417_s7 + $0x8] sm:$0xff] }
0x236d   :  { %3408 = vmatpush3.msra.mxu0 %v2837_v32 }
0x236e   :  { %3409 = vmatprep.subr.mxu0 %v2836_v34 }
0x236f   :  { %3410 = vmatpush3.msra.mxu0 %v2836_v34 }
0x2370   :  { %3411 = vmatprep.subr.mxu0 %v2835_v33 }
0x2371   :  { %3412 = vmatpush3.msra.mxu0 %v2835_v33 }
0x242c   :  { %v3395_v37 = vpop.f32.mrf.mxu0 }
0x242d   :  { %v2634_v57 = vadd.f32 %v3395_v37, %v1677_v36  ;;  %v2834_v37 = vld [vmem:[%s4417_s7] sm:$0xff] }
0x242e   :  { %v2624_v39 = vpop.f32.mrf.mxu0  ;;  %3413 = vmatprep.subr.mxu0 %v2834_v37 }
0x242f   :  { %3651 = vtanh.f32 %v2634_v57  ;;  %v2633_v3 = vadd.f32 %v2624_v39, %v1672_v38  ;;  %v3023_v58 = vmul.f32 -1.442695, %v2634_v57  ;;  %3414 = vmatpush3.msra.mxu0 %v2834_v37 }
0x2431   :  { %3653 = vtanh.f32 %v2633_v3  ;;  %v3022_v41 = vmul.f32 -1.442695, %v2633_v3 }
0x2432   :  { %3655 = vpow2.f32 %v3023_v58  ;;  %v3028_v58 = vld [vmem:[#allocation4] ss:$0 sm:$0xff] }
0x2433   :  { %3657 = vpow2.f32 %v3022_v41 }
0x243c   :  { %v3652_v40 = vpop.eup %3651 }
0x243d   :  { %2655 = vrot.lane.b32.xlu1 %v3652_v40, %s3777_s16 }
0x243e   :  { %v3654_v11 = vpop.eup %3653 }
0x243f   :  { %2653 = vrot.lane.b32.xlu0 %v3654_v11, %s3777_s16  ;;  %v3656_v24 = vpop.eup %3655 }
0x2440   :  { %v3658_v5 = vpop.eup %3657  ;;  %v2642_v8 = vadd.f32 1.0, %v3656_v24 }
0x2441   :  { %v2641_v42 = vadd.f32 1.0, %v3658_v5 }
0x2442   :  { %3659 = vrcp.f32 %v2642_v8 }
0x2443   :  { %3661 = vrcp.f32 %v2641_v42 }
0x244f   :  { %v3660_v25 = vpop.eup %3659 }
0x2450   :  { %v3662_v45 = vpop.eup %3661  ;;  %v2650_v49 = vmul.f32 %v3660_v25, %v2529_v21 }
0x2451   :  { %v2649_v44 = vmul.f32 %v3662_v45, %v2528_v28 }
0x24af   :  { %v2656_v9 = vpop.permute.xlu1 %2655 }
0x24b0   :  { %v2660_v43 = vmul.f32 %v3660_v25, %v2656_v9 }
0x24b1   :  { %v2654_v46 = vpop.permute.xlu0 %2653 }
0x24b2   :  { %2665 = vrot.lane.b32.xlu1 %v2660_v43, %s3778_s17  ;;  %v2659_v48 = vmul.f32 %v3662_v45, %v2654_v46 }
0x24b4   :  { %2663 = vrot.lane.b32.xlu0 %v2659_v48, %s3778_s17 }
0x2524   :  { %v2666_v55 = vpop.permute.xlu1 %2665 }
0x2525   :  { %v2670_v56 = vadd.f32 %v2666_v55, %v2650_v49 }
0x2526   :  { %v2664_v62 = vpop.permute.xlu0 %2663 }
0x2527   :  { %3663 = vtanh.f32 %v2670_v56  ;;  %v2669_v63 = vadd.f32 %v2664_v62, %v2649_v44 }
0x2529   :  { %3665 = vtanh.f32 %v2669_v63 }
0x2534   :  { %v3664_v47 = vpop.eup %3663 }
0x2535   :  { %2677 = vrot.lane.b32.xlu1 %v3664_v47, %s3777_s16 }
0x2536   :  { %v3666_v0 = vpop.eup %3665 }
0x2537   :  { %2675 = vrot.lane.b32.xlu0 %v3666_v0, %s3777_s16 }
0x25a7   :  { %v2678_v2 = vpop.permute.xlu1 %2677 }
0x25a8   :  { %v2682_v4 = vmul.f32 %v3660_v25, %v2678_v2 }
0x25a9   :  { %v2676_v50 = vpop.permute.xlu0 %2675 }
0x25aa   :  { %2687 = vrot.lane.b32.xlu1 %v2682_v4, %s3778_s17  ;;  %v2681_v6 = vmul.f32 %v3662_v45, %v2676_v50 }
0x25ac   :  { %2685 = vrot.lane.b32.xlu0 %v2681_v6, %s3778_s17 }
0x261c   :  { %v2688_v10 = vpop.permute.xlu1 %2687 }
0x261d   :  { %2692 = vst.msk [vmem:[#allocation3 + $0x68] sm:$0xff] %vm330_vm1, %v2688_v10 }
0x261e   :  { %v2686_v51 = vpop.permute.xlu0 %2685 }
0x261f   :  { %2691 = vst.msk [vmem:[#allocation3 + $0x60] sm:$0xff] %vm330_vm1, %v2686_v51  ;;  %3404 = vmatprep.mubr.msk.f32.mxu1 %vm330_vm1, %v2686_v51 }
0x2620   :  { %3405 = vmatmul.mubr.msk.f32.vlgmr.msra.gmra.mxu1 %vm330_vm1, %v2688_v10 }
0x26e0   :  { %v3406_v54 = vpop.f32.mrf.mxu1 }
0x26e1   :  { %v2775_v13 = vadd.f32 %v3406_v54, %v1687_v52 }
0x26e2   :  { %v2765_v61 = vpop.f32.mrf.mxu1 }
0x26e3   :  { %3667 = vtanh.f32 %v2775_v13  ;;  %v2774_v15 = vadd.f32 %v2765_v61, %v1682_v53  ;;  %v3027_v1 = vmul.f32 -1.442695, %v2775_v13 }
0x26e5   :  { %3669 = vtanh.f32 %v2774_v15  ;;  %v3026_v14 = vmul.f32 -1.442695, %v2774_v15 }
0x26e6   :  { %3671 = vpow2.f32 %v3027_v1 }
0x26e7   :  { %3673 = vpow2.f32 %v3026_v14 }
0x26f0   :  { %v3668_v16 = vpop.eup %3667 }
0x26f1   :  { %2796 = vrot.lane.b32.xlu1 %v3668_v16, %s3777_s16 }
0x26f2   :  { %v3670_v60 = vpop.eup %3669 }
0x26f3   :  { %2794 = vrot.lane.b32.xlu0 %v3670_v60, %s3777_s16  ;;  %v3672_v26 = vpop.eup %3671 }
0x26f4   :  { %v3674_v17 = vpop.eup %3673  ;;  %v2783_v18 = vadd.f32 1.0, %v3672_v26 }
0x26f5   :  { %v2782_v19 = vadd.f32 1.0, %v3674_v17 }
0x26f6   :  { %3675 = vrcp.f32 %v2783_v18 }
0x26f7   :  { %3677 = vrcp.f32 %v2782_v19 }
0x2703   :  { %v3676_v12 = vpop.eup %3675 }
0x2704   :  { %v3678_v20 = vpop.eup %3677  ;;  %v2791_v23 = vmul.f32 %v3676_v12, %v2670_v56 }
0x2705   :  { %v2790_v29 = vmul.f32 %v3678_v20, %v2669_v63 }
0x2763   :  { %v2797_v27 = vpop.permute.xlu1 %2796 }
0x2764   :  { %v2801_v59 = vmul.f32 %v3676_v12, %v2797_v27 }
0x2765   :  { %v2795_v21 = vpop.permute.xlu0 %2794 }
0x2766   :  { %2806 = vrot.lane.b32.xlu1 %v2801_v59, %s3778_s17  ;;  %v2800_v22 = vmul.f32 %v3678_v20, %v2795_v21 }
0x2768   :  { %2804 = vrot.lane.b32.xlu0 %v2800_v22, %s3778_s17 }
0x27d8   :  { %v2807_v28 = vpop.permute.xlu1 %2806 }
0x27d9   :  { %v2811_v7 = vadd.f32 %v2807_v28, %v2791_v23 }
0x27da   :  { %v2805_v30 = vpop.permute.xlu0 %2804 }
0x27db   :  { %3679 = vtanh.f32 %v2811_v7  ;;  %v2810_v31 = vadd.f32 %v2805_v30, %v2790_v29 }
0x27dd   :  { %3681 = vtanh.f32 %v2810_v31 }
0x27e8   :  { %v3680_v35 = vpop.eup %3679 }
0x27e9   :  { %2818 = vrot.lane.b32.xlu1 %v3680_v35, %s3777_s16 }
0x27ea   :  { %v3682_v36 = vpop.eup %3681 }
0x27eb   :  { %2816 = vrot.lane.b32.xlu0 %v3682_v36, %s3777_s16 }
0x285b   :  { %v2819_v38 = vpop.permute.xlu1 %2818 }
0x285c   :  { %v2823_v57 = vmul.f32 %v3676_v12, %v2819_v38 }
0x285d   :  { %v2817_v39 = vpop.permute.xlu0 %2816 }
0x285e   :  { %2828 = vrot.lane.b32.xlu1 %v2823_v57, %s3778_s17  ;;  %v2822_v3 = vmul.f32 %v3678_v20, %v2817_v39 }
0x2860   :  { %2826 = vrot.lane.b32.xlu0 %v2822_v3, %s3778_s17 }
0x28d0   :  { %v2829_v40 = vpop.permute.xlu1 %2828 }
0x28d1   :  { %2833 = vst.msk [vmem:[#allocation3 + $0x78] sm:$0xff] %vm330_vm1, %v2829_v40 }
0x28d2   :  { %v2827_v11 = vpop.permute.xlu0 %2826 }
0x28d3   :  { %2832 = vst.msk [vmem:[#allocation3 + $0x70] sm:$0xff] %vm330_vm1, %v2827_v11  ;;  %3415 = vmatprep.mubr.msk.f32.mxu0 %vm330_vm1, %v2827_v11 }
0x28d4   :  { %3416 = vmatmul.mubr.msk.f32.vlgmr.msra.gmra.mxu0 %vm330_vm1, %v2829_v40 }
0x2994   :  { %v3417_v41 = vpop.f32.mrf.mxu0 }
0x2995   :  { %v2921_v24 = vadd.f32 %v3417_v41, %v3028_v58 }
0x2996   :  { %v2915_v5 = vpop.f32.mrf.mxu0 }
0x2997   :  { %2926 = vst.msk [vmem:[%s4419_s9 + $0x8] sm:$0xff] %vm2924_vm2, %v2921_v24  ;;  %v2916_v8 = vadd.f32 %v3028_v58, %v2915_v5 }
0x2999   :  { %2925 = vst.msk [vmem:[%s4419_s9] sm:$0xff] %vm2924_vm2, %v2916_v8 }
0x299a   :  { %2931 = vsyncpa [#allocation6], 1 }
0x299b   :  { %2932 = vsyncpa [#allocation8], 1 }
0x299c   :  { %2933 = vsyncpa [#allocation11], 1 }

</bundles_post_ra>
